<compile_context>
chip_gen: v7x
topology: tpu7x:2x2x1
jax: 0.10.0
libtpu: 0.0.40
codegen_flags: <defaults>
</compile_context>

<pallas_src>
import functools

import numpy as np
import jax
import jax.numpy as jnp
from jax import lax
from jax.experimental import pallas as pl
from jax.experimental.pallas import tpu as pltpu

HIGHEST = lax.Precision.HIGHEST


def _round_up(a, b):
    return ((a + b - 1) // b) * b


# ---------------------------------------------------------------------------
# Fused kernel.
# Grid: (class tiles i, sample tiles j) — i "parallel" (megacore), j "arbitrary"
# (VMEM scratch carries the class-side precompute across the inner N loop).
#
# Layouts: x_aug is (Np, 2*Dp) bf16 = [x, x*x] row-major. Class-side operands live
# transposed: sums^T (Dp, Mp), Ulda^T (Dp, Dp), d_wc/d_ac as (Dp, 1) columns, counts as
# (1, Mp) lane-major. Output is (Np, Mp) f32, lane-dense.
# ---------------------------------------------------------------------------
def _gauss_quadratic_kernel(counts_ref, sums_t_ref, ulda_t_ref, dwc_ref, dac_ref,
                            xaug_ref, out_ref, op_ref, c_ref, *, r):
    Dp = dwc_ref.shape[0]

    # ---- grid-invariant class-side precompute: once per class tile (j == 0) ----
    @pl.when(pl.program_id(1) == 0)
    def _():
        cnt = jnp.maximum(counts_ref[...], 1e-10)                    # (1, tM)
        # xsum^T = Ulda^T @ sums^T  (== (sums @ Ulda)^T); tiny, keep f32-exact for parity.
        xsum_t = jnp.dot(ulda_t_ref[...], sums_t_ref[...],
                         preferred_element_type=jnp.float32,
                         precision=HIGHEST)                          # (Dp, tM)
        mu_t = xsum_t / cnt                                          # (Dp, tM)
        # Bayes enrollment; compute_Nsc covers r=0 (1/cnt) and r=1 (1.0) as well.
        nsc = (1.0 + r) / (cnt * (1.0 - r) + 2.0 * r)                # (1, tM)
        dwc = dwc_ref[...]                                           # (Dp, 1), pad = 1.0
        dac = dac_ref[...]                                           # (Dp, 1), pad = 0.0
        cov_mean_t = dwc * nsc                                       # (Dp, tM)
        temp_t = dac / (dac + cov_mean_t)                            # (Dp, tM)
        mu_t = mu_t * temp_t
        cov_model_t = temp_t * cov_mean_t
        inv = 1.0 / (cov_model_t + dwc)    # covars = cov_model + d_wc (vb_flag=False)
        mu_inv = mu_t * inv
        # Fused score operand for the single MXU dot: [ (means*inv)^T ; -0.5*inv^T ].
        op_ref[:Dp, :] = mu_inv.astype(op_ref.dtype)
        op_ref[Dp:, :] = (-0.5 * inv).astype(op_ref.dtype)
        # Pre-scaled per-class constant: -0.5 * sum_d (mu^2*inv - log inv).
        c_ref[...] = -0.5 * jnp.sum(mu_t * mu_inv - jnp.log(inv), axis=0, keepdims=True)

    # ---- per sample-tile body: ONE bf16 MXU dot (K = 2*Dp) + one broadcast add ----
    out_ref[...] = (jnp.dot(xaug_ref[...], op_ref[...],
                            preferred_element_type=jnp.float32)
                    + c_ref[...]).astype(out_ref.dtype)


# ---------------------------------------------------------------------------
# Module wrapper: GaussQuadratic.forward (w=None, OOS=False, loo_flag=True)
# ---------------------------------------------------------------------------
def gauss_quadratic_forward(x, counts, sums, ulda, d_wc, d_ac, r=0.9):
    N, D = x.shape
    M = sums.shape[0]

    # ---- tiling ----
    Dp = _round_up(D, 128)                  # lane-dense K; padded dims are inert (see pads)
    Mp = _round_up(M, 128)
    # Class tile: largest of {512, 384, 256, 128} that divides Mp (no extra class padding).
    tM = 128
    for cand in (512, 384, 256):
        if Mp % cand == 0:
            tM = cand
            break
    # v7x megacore: prefer >= 2 class tiles so both TensorCores get 'parallel' work.
    if Mp // tM < 2 and Mp >= 256:
        half = max(128, (Mp // 2) // 128 * 128)
        tM = half if Mp % half == 0 else 128
    tN = min(_round_up(N, 8), 512)          # big sample tiles amortize grid-step overhead
    Np = _round_up(N, tN)

    # ---- one-time layout plumbing (glue, outside the kernel) ----
    x32 = x.astype(jnp.float32)
    x_p = jnp.zeros((Np, Dp), jnp.float32).at[:N, :D].set(x32)
    # Fused MXU operand [x, x*x], cast to bf16 once (halves the re-streamed HBM bytes).
    x_aug = jnp.concatenate([x_p, x_p * x_p], axis=-1).astype(jnp.bfloat16)  # (Np, 2*Dp)
    sums_t = jnp.zeros((Dp, Mp), jnp.float32).at[:D, :M].set(sums.astype(jnp.float32).T)
    counts_p = jnp.ones((1, Mp), jnp.float32).at[0, :M].set(counts.astype(jnp.float32))
    ulda_t = jnp.zeros((Dp, Dp), jnp.float32).at[:D, :D].set(ulda.astype(jnp.float32).T)
    # Pad d_wc with 1.0 and d_ac with 0.0: padded dims give temp=0, mu=0, inv=1
    # (no NaN from 0/0, zero contribution to the per-class constant).
    dwc_c = jnp.ones((Dp, 1), jnp.float32).at[:D, 0].set(d_wc.astype(jnp.float32))
    dac_c = jnp.zeros((Dp, 1), jnp.float32).at[:D, 0].set(d_ac.astype(jnp.float32))

    kernel = functools.partial(_gauss_quadratic_kernel, r=float(r))
    out = pl.pallas_call(
        kernel,
        out_shape=jax.ShapeDtypeStruct((Np, Mp), jnp.float32),
        grid=(Mp // tM, Np // tN),
        in_specs=[
            pl.BlockSpec((1, tM), lambda i, j: (0, i)),       # counts (lane-major)
            pl.BlockSpec((Dp, tM), lambda i, j: (0, i)),      # sums^T
            pl.BlockSpec((Dp, Dp), lambda i, j: (0, 0)),      # Ulda^T (resident)
            pl.BlockSpec((Dp, 1), lambda i, j: (0, 0)),       # d_wc column (pad = 1)
            pl.BlockSpec((Dp, 1), lambda i, j: (0, 0)),       # d_ac column (pad = 0)
            pl.BlockSpec((tN, 2 * Dp), lambda i, j: (j, 0)),  # [x, x*x] tile (bf16)
        ],
        out_specs=pl.BlockSpec((tN, tM), lambda i, j: (j, i)),
        scratch_shapes=[
            pltpu.VMEM((2 * Dp, tM), jnp.bfloat16),   # [(means*inv)^T ; -0.5*inv^T]
            pltpu.VMEM((1, tM), jnp.float32),         # -0.5 * per-class constant
        ],
        compiler_params=pltpu.CompilerParams(
            dimension_semantics=("parallel", "arbitrary"),
            vmem_limit_bytes=32 * 1024 * 1024),
    )(counts_p, sums_t, ulda_t, dwc_c, dac_c, x_aug)

    return out[:N, :M]
    # TODO(synk): per-sample `w` branch and OOS subtraction are non-default constructor
    # paths; update_params/update_counts is a host-side numpy stat update, not part of
    # the forward pass. Output could be emitted in bf16 if downstream scoring tolerates it.


# Pure-JAX reference mirroring the PyTorch forward (exact f32, for verification).
def _ref_forward(x, counts, sums, ulda, d_wc, d_ac, r):
    cnt = jnp.maximum(counts, 1e-10)
    xsum = jnp.matmul(sums, ulda, precision=HIGHEST)
    mu = xsum / cnt[:, None]
    nsc = (1.0 + r) / (cnt * (1.0 - r) + 2.0 * r)
    cov_mean = d_wc[None, :] * nsc[:, None]
    temp = d_ac[None, :] / (d_ac[None, :] + cov_mean)
    mu = mu * temp
    cov_model = temp * cov_mean
    covars = cov_model + d_wc[None, :]
    inv = 1.0 / covars
    LL = -0.5 * (-jnp.sum(jnp.log(inv), 1)[None, :]
                 + jnp.sum(mu * mu * inv, 1)[None, :]
                 - 2.0 * jnp.matmul(x, (mu * inv).T, precision=HIGHEST))
    LL = LL - 0.5 * jnp.matmul(x * x, inv.T, precision=HIGHEST)
    return LL


if __name__ == "__main__":
    # Small shapes consistent with the module: embedding_dim=32, num_classes=64, batch=16
    D, M, N = 32, 64, 16
    r = 0.9

    key = jax.random.PRNGKey(0)
    k_sums, k_ulda, k_x, k_wc, k_ac = jax.random.split(key, 5)

    # sums: xavier_normal_ on a (M, D) buffer -> std = sqrt(2 / (M + D))
    xavier_std = float(np.sqrt(2.0 / (M + D)))
    sums = xavier_std * jax.random.normal(k_sums, (M, D), dtype=jnp.float32)
    counts = jnp.ones((M,), dtype=jnp.float32)            # buffer init: ones
    ulda = jax.random.normal(k_ulda, (D, D), dtype=jnp.float32) / np.sqrt(D)
    d_wc = 0.5 + jnp.abs(jax.random.normal(k_wc, (D,), dtype=jnp.float32))
    d_ac = 0.5 + jnp.abs(jax.random.normal(k_ac, (D,), dtype=jnp.float32))
    x = jax.random.normal(k_x, (N, D), dtype=jnp.float32)

    LL = jax.block_until_ready(gauss_quadratic_forward(x, counts, sums, ulda, d_wc, d_ac, r))
    LL_ref = jax.block_until_ready(_ref_forward(x, counts, sums, ulda, d_wc, d_ac, r))

    assert LL.shape == (N, M) and LL.dtype == jnp.float32
    # Tolerance admits the bf16-input / f32-accumulate score dot (per perf review).
    assert np.allclose(np.asarray(LL), np.asarray(LL_ref), rtol=5e-3, atol=5e-2), \
        "Pallas result mismatch vs JAX reference"

    print("KERNEL_OK")
</pallas_src>

<mosaic_0001>
module attributes {stable_mosaic.version = 11 : i64} {
  func.func @_gauss_quadratic_kernel(%arg0: i32, %arg1: i32, %arg2: memref<1x128xf32, #tpu.memory_space<vmem>>, %arg3: memref<128x128xf32, #tpu.memory_space<vmem>>, %arg4: memref<128x128xf32, #tpu.memory_space<vmem>>, %arg5: memref<128x1xf32, #tpu.memory_space<vmem>>, %arg6: memref<128x1xf32, #tpu.memory_space<vmem>>, %arg7: memref<16x256xbf16, #tpu.memory_space<vmem>>, %arg8: memref<16x128xf32, #tpu.memory_space<vmem>>, %arg9: memref<256x128xbf16, #tpu.memory_space<vmem>>, %arg10: memref<1x128xf32, #tpu.memory_space<vmem>>) attributes {dimension_semantics = [#tpu.dimension_semantics<parallel>, #tpu.dimension_semantics<arbitrary>], iteration_bounds = array<i64: 1, 1>, scalar_prefetch = 0 : i64, scratch_operands = 2 : i64, tpu.core_type = #tpu.core_type<tc>, window_params = [{transform_indices = @transform_0, window_bounds = array<i64: 1, 128>}, {transform_indices = @transform_1, window_bounds = array<i64: 128, 128>}, {pipeline_mode = #tpu.pipeline_mode<synchronous>, transform_indices = @transform_2, window_bounds = array<i64: 128, 128>}, {pipeline_mode = #tpu.pipeline_mode<synchronous>, transform_indices = @transform_3, window_bounds = array<i64: 128, 1>}, {pipeline_mode = #tpu.pipeline_mode<synchronous>, transform_indices = @transform_4, window_bounds = array<i64: 128, 1>}, {transform_indices = @transform_5, window_bounds = array<i64: 16, 256>}, {transform_indices = @transform_6, window_bounds = array<i64: 16, 128>}]} {
    %c0_i32 = arith.constant 0 : i32
    %0 = arith.cmpi eq, %arg1, %c0_i32 : i32
    %1 = arith.extui %0 : i1 to i32
    %c0_i32_0 = arith.constant 0 : i32
    %2 = arith.cmpi ne, %1, %c0_i32_0 : i32
    scf.if %2 {
      %c0_8 = arith.constant 0 : index
      %c0_9 = arith.constant 0 : index
      %10 = vector.load %arg2[%c0_8, %c0_9] : memref<1x128xf32, #tpu.memory_space<vmem>>, vector<1x128xf32>
      %cst_10 = arith.constant 1.000000e-10 : f32
      %11 = vector.broadcast %cst_10 : f32 to vector<1x128xf32>
      %12 = arith.maximumf %10, %11 : vector<1x128xf32>
      %c0_11 = arith.constant 0 : index
      %c0_12 = arith.constant 0 : index
      %13 = vector.load %arg4[%c0_11, %c0_12] : memref<128x128xf32, #tpu.memory_space<vmem>>, vector<128x128xf32>
      %c0_13 = arith.constant 0 : index
      %c0_14 = arith.constant 0 : index
      %14 = vector.load %arg3[%c0_13, %c0_14] : memref<128x128xf32, #tpu.memory_space<vmem>>, vector<128x128xf32>
      %cst_15 = arith.constant dense<0.000000e+00> : vector<128x128xf32>
      %15 = tpu.matmul %13, %14, %cst_15 {dimension_numbers = #tpu.dot_dimension_numbers<[1], [0], [0], [1], [0, 0, 1, 1], [], []>, precision = #tpu.contract_precision<fp32>} : vector<128x128xf32>, vector<128x128xf32>, vector<128x128xf32> -> vector<128x128xf32>
      %16 = vector.broadcast %12 : vector<1x128xf32> to vector<128x128xf32>
      %17 = arith.divf %15, %16 : vector<128x128xf32>
      %cst_16 = arith.constant 1.000000e-01 : f32
      %18 = vector.broadcast %cst_16 : f32 to vector<1x128xf32>
      %19 = arith.mulf %12, %18 : vector<1x128xf32>
      %cst_17 = arith.constant 1.800000e+00 : f32
      %20 = vector.broadcast %cst_17 : f32 to vector<1x128xf32>
      %21 = arith.addf %19, %20 : vector<1x128xf32>
      %cst_18 = arith.constant 1.900000e+00 : f32
      %22 = vector.broadcast %cst_18 : f32 to vector<1x128xf32>
      %23 = arith.divf %22, %21 : vector<1x128xf32>
      %c0_19 = arith.constant 0 : index
      %c0_20 = arith.constant 0 : index
      %24 = vector.load %arg5[%c0_19, %c0_20] : memref<128x1xf32, #tpu.memory_space<vmem>>, vector<128x1xf32>
      %c0_21 = arith.constant 0 : index
      %c0_22 = arith.constant 0 : index
      %25 = vector.load %arg6[%c0_21, %c0_22] : memref<128x1xf32, #tpu.memory_space<vmem>>, vector<128x1xf32>
      %26 = vector.broadcast %24 : vector<128x1xf32> to vector<128x128xf32>
      %27 = vector.broadcast %23 : vector<1x128xf32> to vector<128x128xf32>
      %28 = arith.mulf %26, %27 : vector<128x128xf32>
      %29 = vector.broadcast %25 : vector<128x1xf32> to vector<128x128xf32>
      %30 = arith.addf %29, %28 : vector<128x128xf32>
      %31 = vector.broadcast %25 : vector<128x1xf32> to vector<128x128xf32>
      %32 = arith.divf %31, %30 : vector<128x128xf32>
      %33 = arith.mulf %17, %32 : vector<128x128xf32>
      %34 = arith.mulf %32, %28 : vector<128x128xf32>
      %35 = vector.broadcast %24 : vector<128x1xf32> to vector<128x128xf32>
      %36 = arith.addf %34, %35 : vector<128x128xf32>
      %cst_23 = arith.constant 1.000000e+00 : f32
      %37 = vector.broadcast %cst_23 : f32 to vector<128x128xf32>
      %38 = arith.divf %37, %36 : vector<128x128xf32>
      %39 = arith.mulf %33, %38 : vector<128x128xf32>
      %40 = arith.truncf %39 : vector<128x128xf32> to vector<128x128xbf16>
      %c0_24 = arith.constant 0 : index
      %c0_25 = arith.constant 0 : index
      %41 = vector.load %arg9[%c0_24, %c0_25] : memref<256x128xbf16, #tpu.memory_space<vmem>>, vector<128x128xbf16>
      tpu.vector_store %arg9[%c0_24, %c0_25], %40 {strides = array<i32>} : memref<256x128xbf16, #tpu.memory_space<vmem>>, vector<128x128xbf16>,
      %cst_26 = arith.constant -5.000000e-01 : f32
      %42 = vector.broadcast %cst_26 : f32 to vector<128x128xf32>
      %43 = arith.mulf %42, %38 : vector<128x128xf32>
      %44 = arith.truncf %43 : vector<128x128xf32> to vector<128x128xbf16>
      %c128 = arith.constant 128 : index
      %c0_27 = arith.constant 0 : index
      %45 = vector.load %arg9[%c128, %c0_27] : memref<256x128xbf16, #tpu.memory_space<vmem>>, vector<128x128xbf16>
      tpu.vector_store %arg9[%c128, %c0_27], %44 {strides = array<i32>} : memref<256x128xbf16, #tpu.memory_space<vmem>>, vector<128x128xbf16>,
      %46 = arith.mulf %33, %39 : vector<128x128xf32>
      %47 = math.log %38 : vector<128x128xf32>
      %48 = arith.subf %46, %47 : vector<128x128xf32>
      %cst_28 = arith.constant dense<0.000000e+00> : vector<128xf32>
      %49 = vector.multi_reduction <add>, %48, %cst_28 [0] : vector<128x128xf32> to vector<128xf32>
      %50 = vector.shape_cast %49 : vector<128xf32> to vector<1x128xf32>
      %cst_29 = arith.constant -5.000000e-01 : f32
      %51 = vector.broadcast %cst_29 : f32 to vector<1x128xf32>
      %52 = arith.mulf %51, %50 : vector<1x128xf32>
      %c0_30 = arith.constant 0 : index
      %c0_31 = arith.constant 0 : index
      %53 = vector.load %arg10[%c0_30, %c0_31] : memref<1x128xf32, #tpu.memory_space<vmem>>, vector<1x128xf32>
      tpu.vector_store %arg10[%c0_30, %c0_31], %52 {strides = array<i32>} : memref<1x128xf32, #tpu.memory_space<vmem>>, vector<1x128xf32>,
    } else {
    }
    %c0 = arith.constant 0 : index
    %c0_1 = arith.constant 0 : index
    %3 = vector.load %arg7[%c0, %c0_1] : memref<16x256xbf16, #tpu.memory_space<vmem>>, vector<16x256xbf16>
    %c0_2 = arith.constant 0 : index
    %c0_3 = arith.constant 0 : index
    %4 = vector.load %arg9[%c0_2, %c0_3] : memref<256x128xbf16, #tpu.memory_space<vmem>>, vector<256x128xbf16>
    %cst = arith.constant dense<0.000000e+00> : vector<16x128xf32>
    %5 = tpu.matmul %3, %4, %cst {dimension_numbers = #tpu.dot_dimension_numbers<[1], [0], [0], [1], [0, 0, 1, 1], [], []>} : vector<16x256xbf16>, vector<256x128xbf16>, vector<16x128xf32> -> vector<16x128xf32>
    %c0_4 = arith.constant 0 : index
    %c0_5 = arith.constant 0 : index
    %6 = vector.load %arg10[%c0_4, %c0_5] : memref<1x128xf32, #tpu.memory_space<vmem>>, vector<1x128xf32>
    %7 = vector.broadcast %6 : vector<1x128xf32> to vector<16x128xf32>
    %8 = arith.addf %5, %7 : vector<16x128xf32>
    %c0_6 = arith.constant 0 : index
    %c0_7 = arith.constant 0 : index
    %9 = vector.load %arg8[%c0_6, %c0_7] : memref<16x128xf32, #tpu.memory_space<vmem>>, vector<16x128xf32>
    tpu.vector_store %arg8[%c0_6, %c0_7], %8 {strides = array<i32>} : memref<16x128xf32, #tpu.memory_space<vmem>>, vector<16x128xf32>,
    return
  }
  func.func @transform_0(%arg0: i32, %arg1: i32) -> (i32, i32) {
    %c0_i32 = arith.constant 0 : i32
    %c0_i32_0 = arith.constant 0 : i32
    return %c0_i32, %arg0 : i32, i32
  }
  func.func @transform_1(%arg0: i32, %arg1: i32) -> (i32, i32) {
    %c0_i32 = arith.constant 0 : i32
    %c0_i32_0 = arith.constant 0 : i32
    return %c0_i32, %arg0 : i32, i32
  }
  func.func @transform_2(%arg0: i32, %arg1: i32) -> (i32, i32) {
    %c0_i32 = arith.constant 0 : i32
    %c0_i32_0 = arith.constant 0 : i32
    %c0_i32_1 = arith.constant 0 : i32
    return %c0_i32, %c0_i32_0 : i32, i32
  }
  func.func @transform_3(%arg0: i32, %arg1: i32) -> (i32, i32) {
    %c0_i32 = arith.constant 0 : i32
    %c0_i32_0 = arith.constant 0 : i32
    %c0_i32_1 = arith.constant 0 : i32
    return %c0_i32, %c0_i32_0 : i32, i32
  }
  func.func @transform_4(%arg0: i32, %arg1: i32) -> (i32, i32) {
    %c0_i32 = arith.constant 0 : i32
    %c0_i32_0 = arith.constant 0 : i32
    %c0_i32_1 = arith.constant 0 : i32
    return %c0_i32, %c0_i32_0 : i32, i32
  }
  func.func @transform_5(%arg0: i32, %arg1: i32) -> (i32, i32) {
    %c0_i32 = arith.constant 0 : i32
    %c0_i32_0 = arith.constant 0 : i32
    return %arg1, %c0_i32 : i32, i32
  }
  func.func @transform_6(%arg0: i32, %arg1: i32) -> (i32, i32) {
    %c0_i32 = arith.constant 0 : i32
    return %arg1, %arg0 : i32, i32
  }
}

</mosaic_0001>

<bundles_post_ra>
// kernel: tpu_custom_call.1
= control target key start
LH: loop header
LB: loop body
LE: loop exit
PB: predicated region body
PF: predicated region fallthrough
CT: control target
= control target key end

     0   :  { %11 = vsyncpa [#allocation5], 0  ;;  %s4149_s0 = inlined_call_operand.hbm [shape: f32[1,128], index: 0, kind: input, shape index: {}]   ;;  %s4150_s1 = inlined_call_operand.vmem [shape: f32[128,128], index: 1, kind: input, shape index: {}]   ;;  %s4151_s2 = inlined_call_operand.vmem [shape: f32[128,128], index: 2, kind: input, shape index: {}]   ;;  %s4152_s3 = inlined_call_operand.vmem [shape: f32[128,1], index: 3, kind: input, shape index: {}]   ;;  %s4153_s4 = inlined_call_operand.vmem [shape: f32[128,1], index: 4, kind: input, shape index: {}]   ;;  %s4154_s5 = inlined_call_operand.vmem [shape: bf16[16,256], index: 5, kind: input, shape index: {}]   ;;  %s4155_s6 = inlined_call_operand.hbm [shape: f32[16,128], index: 6, kind: output, shape index: {}]  }
   0x1   :  { %12 = vsyncpa [#allocation6], 0  ;;  %s2959_s21 = smov [#allocation4]   ;;  %s2911_s25 = scalar_lea.hbm %s4149_s0, 16 }
   0x2   :  { %s19_s22 = sshll.u32 %s2959_s21, 4  ;;  %p2912_p0 = scmp.ne.s32.totalorder %s4149_s0, %s2911_s25  ;;  %s20_s22 = int_to_ptr.vmem [resolvable:$true] %s19_s22 }
   0x3   :  { %p2915_p1 = scmp.lt.u32.totalorder %s2911_s25, %s4149_s0 }
   0x5   :  { %p2917_p2 = pnand %p2915_p1, %p2912_p0 }
   0x7   :  { %2920 = shalt.err (!%p2917_p2)
}
   0x8   :  { %s2921_s30 = scalar_lea.vmem %s20_s22, 16  ;;  %s2925_s7 = scalar_lea.vmem %s20_s22, 32 }
   0x9   :  { %p2922_p3 = scmp.ne.s32.totalorder %s20_s22, %s2921_s30  ;;  %p2926_p4 = scmp.lt.s32.totalorder %s20_s22, %s20_s22 }
   0xa   :  { %p2927_p5 = scmp.lt.s32.totalorder %s2925_s7, %s2921_s30 }
   0xc   :  { %p2928_p6 = por %p2927_p5, %p2926_p4 }
   0xe   :  { %p2929_p7 = pnand %p2928_p6, %p2922_p3 }
  0x10   :  { %2932 = shalt.err (!%p2929_p7)
}
  0x11   :  { %22 = dma.hbm_to_vmem [thread:$0]  %s4149_s0, 16, %s20_s22, [#allocation5]  }
  0x12   :  { %2955 = dma.done.wait [#allocation5], 16  }
  0x13   :  { %2956 = vsyncadd [#allocation5], 4294967280  ;;  %v2960_v0 = vmov 0   ;;  %v59_v1 = vld [vmem:[%s4150_s1] sm:$0xff]  ;;  %v60_v2 = vld [vmem:[%s4150_s1 + $0x8] sm:$0xff] }
  0x14   :  { %2807 = vset.pattern.permute.xlu1 %v2960_v0  ;;  %2806 = vset.pattern.permute.xlu0 %v2960_v0  ;;  %v3020_v3 = vld [vmem:[%s4150_s1 + $0x10] sm:$0xff]  ;;  %v76_v4 = vand.u32 4294901760, %v59_v1  ;;  %v79_v5 = vand.u32 4294901760, %v60_v2  ;;  %v3025_v6 = vld [vmem:[%s4150_s1 + $0x18] sm:$0xff]  ;;  %v3031_v8 = vld [vmem:[%s4150_s1 + $0x20] sm:$0xff] }
  0x15   :  { %v82_v7 = vand.u32 4294901760, %v3020_v3  ;;  %v3036_v9 = vld [vmem:[%s4150_s1 + $0x28] sm:$0xff]  ;;  %v85_v10 = vand.u32 4294901760, %v3025_v6  ;;  %v88_v12 = vand.u32 4294901760, %v3031_v8  ;;  %v3052_v15 = vld [vmem:[%s4150_s1 + $0x30] sm:$0xff]  ;;  %v3057_v16 = vld [vmem:[%s4150_s1 + $0x38] sm:$0xff] }
  0x16   :  { %v3039_v11 = vpack.c.bf16 %v79_v5, %v76_v4  ;;  %v91_v13 = vand.u32 4294901760, %v3036_v9  ;;  %v43_v17 = vld [vmem:[%s4151_s2] sm:$0xff]  ;;  %v94_v20 = vand.u32 4294901760, %v3052_v15  ;;  %v97_v21 = vand.u32 4294901760, %v3057_v16  ;;  %v44_v23 = vld [vmem:[%s4151_s2 + $0x8] sm:$0xff]  ;;  %v3103_v28 = vld [vmem:[%s4150_s1 + $0x50] sm:$0xff] }
  0x17   :  { %v3047_v14 = vpack.c.bf16 %v85_v10, %v82_v7  ;;  %v3066_v18 = vand.u32 4294901760, %v43_v17  ;;  %v3081_v22 = vld [vmem:[%s4150_s1 + $0x40] sm:$0xff]  ;;  %v3089_v24 = vld [vmem:[%s4150_s1 + $0x48] sm:$0xff]  ;;  %v3108_v30 = vand.u32 4294901760, %v44_v23  ;;  %v3110_v31 = vsub.f32 %v59_v1, %v76_v4  ;;  %v45_v32 = vld [vmem:[%s4151_s2 + $0x10] sm:$0xff] }
  0x18   :  { %2530 = vmatprep.subr.bf16.mxu1 %v3039_v11  ;;  %2626 = vmatprep.subr.bf16.mxu0 %v3039_v11  ;;  %v3074_v19 = vpack.c.bf16 %v91_v13, %v88_v12  ;;  %v1404_v26 = vld [vmem:[%s4153_s4] sm:$0xff]  ;;  %v1405_v33 = vld [vmem:[%s4153_s4 + $0x8] sm:$0xff]  ;;  %v3127_v35 = vpack.c.bf16 %v97_v21, %v94_v20  ;;  %v4166_v36 = vand.u32 4294901760, %v3081_v22  ;;  %v4165_v37 = vand.u32 4294901760, %v3089_v24  ;;  %v46_v39 = vld [vmem:[%s4151_s2 + $0x18] sm:$0xff] }
  0x19   :  { %2532 = vmatpush3.bf16.msra.mxu1 %v3039_v11  ;;  %2628 = vmatpush3.bf16.msra.mxu0 %v3039_v11  ;;  %v3092_v25 = vsub.f32 %v43_v17, %v3066_v18  ;;  %v1388_v27 = vld [vmem:[%s4152_s3] sm:$0xff]  ;;  %v1389_v34 = vld [vmem:[%s4152_s3 + $0x8] sm:$0xff]  ;;  %v3131_v38 = vsub.f32 %v60_v2, %v79_v5  ;;  %v3139_v40 = vld [vmem:[%s4150_s1 + $0x58] sm:$0xff]  ;;  %v4160_v42 = vand.u32 4294901760, %v3103_v28  ;;  %v3148_v44 = vand.u32 4294901760, %v45_v32 }
  0x1a   :  { %2534 = vmatprep.subr.bf16.mxu1 %v3047_v14  ;;  %2630 = vmatprep.subr.bf16.mxu0 %v3047_v14  ;;  %4211 = vst [vmem:[#allocation10_spill] sm:$0xff] %v3074_v19  ;;  %4213 = vst [vmem:[#allocation12_spill] sm:$0xff] %v3127_v35  ;;  %v3146_v43 = vld [vmem:[%s4150_s1 + $0x60] sm:$0xff]  ;;  %v3155_v45 = vld [vmem:[%s4150_s1 + $0x68] sm:$0xff]  ;;  %v3158_v47 = vsub.f32 %v44_v23, %v3108_v30  ;;  %v319_v48 = vand.u32 4294901760, %v3110_v31  ;;  %v3161_v49 = vand.u32 4294901760, %v46_v39 }
  0x1b   :  { %4212 = vst [vmem:[#allocation11_spill] sm:$0xff] %v3092_v25  ;;  %1524 = vperm.xlu1 %2807, %v1404_v26   ;;  %1422 = vperm.xlu0 %2806, %v1388_v27   ;;  %v158_v29 = vand.u32 4294901760, %v3092_v25  ;;  %v1391_v50 = vld [vmem:[%s4152_s3 + $0x18] sm:$0xff]  ;;  %v1390_v51 = vld [vmem:[%s4152_s3 + $0x10] sm:$0xff]  ;;  %v3175_v52 = vpack.c.bf16 %v4165_v37, %v4166_v36  ;;  %v4159_v53 = vand.u32 4294901760, %v3139_v40  ;;  %v326_v54 = vand.u32 4294901760, %v3131_v38 }
  0x1c   :  { %4214 = vst [vmem:[#allocation13_spill] sm:$0xff] %v3158_v47  ;;  %v3182_v55 = vsub.f32 %v3020_v3, %v82_v7  ;;  %v3187_v56 = vsub.f32 %v3025_v6, %v85_v10  ;;  %v47_v57 = vld [vmem:[%s4151_s2 + $0x20] sm:$0xff]  ;;  %v4157_v58 = vand.u32 4294901760, %v3146_v43  ;;  %v4156_v59 = vand.u32 4294901760, %v3155_v45  ;;  %v3197_v60 = vld [vmem:[%s4150_s1 + $0x70] sm:$0xff]  ;;  %v48_v62 = vld [vmem:[%s4151_s2 + $0x28] sm:$0xff] }
  0x1d   :  { %2536 = vmatpush3.bf16.msra.mxu1 %v3047_v14  ;;  %2632 = vmatpush3.bf16.msra.mxu0 %v3047_v14  ;;  %v159_v41 = vsub.f32 %v3092_v25, %v158_v29  ;;  %4215 = vst [vmem:[#allocation14_spill] sm:$0xff] %v3175_v52  ;;  %v3200_v61 = vsub.f32 %v45_v32, %v3148_v44  ;;  %v3210_v63 = vld [vmem:[%s4150_s1 + $0x78] sm:$0xff]  ;;  %v4158_v0 = vand.u32 4294901760, %v3158_v47  ;;  %v1406_v4 = vld [vmem:[%s4153_s4 + $0x10] sm:$0xff]  ;;  %v3235_v10 = vand.u32 4294901760, %v47_v57 }
  0x1e   :  { %2538 = vmatprep.subr.bf16.mxu1 %v3074_v19  ;;  %2634 = vmatprep.subr.bf16.mxu0 %v3074_v19  ;;  %v320_v1 = vsub.f32 %v3110_v31, %v319_v48  ;;  %v3217_v2 = vsub.f32 %v46_v39, %v3161_v49  ;;  %v1407_v3 = vld [vmem:[%s4153_s4 + $0x18] sm:$0xff]  ;;  %v3231_v5 = vpack.c.bf16 %v4159_v53, %v4160_v42  ;;  %v4167_v7 = vand.u32 4294901760, %v3182_v55  ;;  %v49_v17 = vld [vmem:[%s4151_s2 + $0x30] sm:$0xff] }
  0x1f   :  { %2393 = vmatprep.mubr.f32.mxu0 %v158_v29  ;;  %1529 = vperm.xlu1 %2807, %v1405_v33   ;;  %v160_v46 = vand.u32 4294901760, %v159_v41  ;;  %4216 = vst [vmem:[#allocation15_spill] sm:$0xff] %v3200_v61  ;;  %v327_v6 = vsub.f32 %v3131_v38, %v326_v54  ;;  %v4162_v23 = vand.u32 4294901760, %v3197_v60  ;;  %v340_v26 = vand.u32 4294901760, %v3187_v56  ;;  %v50_v32 = vld [vmem:[%s4151_s2 + $0x38] sm:$0xff] }
  0x20   :  { %1427 = vperm.xlu0 %2806, %v1389_v34   ;;  %4217 = vst [vmem:[#allocation16_spill] sm:$0xff] %v3217_v2  ;;  %4218 = vst [vmem:[#allocation17_spill] sm:$0xff] %v3231_v5  ;;  %v3242_v27 = vand.u32 4294901760, %v48_v62  ;;  %v3247_v29 = vsub.f32 %v3031_v8, %v88_v12  ;;  %v3256_v33 = vpack.c.bf16 %v4156_v59, %v4157_v58  ;;  %v4161_v34 = vand.u32 4294901760, %v3210_v63 }
  0x21   :  { %2540 = vmatpush3.bf16.msra.mxu1 %v3074_v19  ;;  %2636 = vmatpush3.bf16.msra.mxu0 %v3074_v19  ;;  %v4164_v39 = vand.u32 4294901760, %v3200_v61  ;;  %v3263_v41 = vsub.f32 %v3036_v9, %v91_v13  ;;  %v3270_v8 = vsub.f32 %v3158_v47, %v4158_v0  ;;  %v321_v12 = vand.u32 4294901760, %v320_v1  ;;  %v1393_v9 = vld [vmem:[%s4152_s3 + $0x28] sm:$0xff]  ;;  %v1392_v13 = vld [vmem:[%s4152_s3 + $0x20] sm:$0xff] }
  0x22   :  { %2542 = vmatprep.subr.bf16.mxu1 %v3127_v35  ;;  %2638 = vmatprep.subr.bf16.mxu0 %v3127_v35  ;;  %4219 = vst [vmem:[#allocation18_spill] sm:$0xff] %v3242_v27  ;;  %4220 = vst [vmem:[#allocation19_spill] sm:$0xff] %v3256_v33  ;;  %v334_v1 = vsub.f32 %v3182_v55, %v4167_v7  ;;  %v341_v59 = vsub.f32 %v3187_v56, %v340_v26  ;;  %v347_v0 = vand.u32 4294901760, %v3247_v29 }
  0x23   :  { %2225 = vmatprep.mubr.f32.mxu1 %v160_v46  ;;  %1437 = vperm.xlu1 %2807, %v1391_v50   ;;  %v4163_v46 = vand.u32 4294901760, %v3217_v2  ;;  %v3273_v50 = vand.u32 4294901760, %v49_v17  ;;  %v3293_v58 = vsub.f32 %v48_v62, %v3242_v27  ;;  %v3309_v53 = vpack.c.bf16 %v326_v54, %v319_v48 }
  0x24   :  { %1432 = vperm.xlu0 %2806, %v1390_v51   ;;  %v328_v51 = vand.u32 4294901760, %v327_v6  ;;  %v3299_v6 = vsub.f32 %v3052_v15, %v94_v20  ;;  %v3314_v62 = vsub.f32 %v3200_v61, %v4164_v39  ;;  %v354_v42 = vand.u32 4294901760, %v3263_v41  ;;  %v51_v15 = vld [vmem:[%s4151_s2 + $0x40] sm:$0xff] }
  0x25   :  { %2544 = vmatpush3.bf16.msra.mxu1 %v3127_v35  ;;  %2640 = vmatpush3.bf16.msra.mxu0 %v3127_v35  ;;  %4221 = vst [vmem:[#allocation20_spill] sm:$0xff] %v3273_v50  ;;  %4224 = vst [vmem:[#allocation23_spill] sm:$0xff] %v3293_v58  ;;  %v3326_v48 = vsub.f32 %v3217_v2, %v4163_v46  ;;  %v3329_v54 = vsub.f32 %v49_v17, %v3273_v50  ;;  %v342_v39 = vand.u32 4294901760, %v341_v59 }
  0x26   :  { %2546 = vmatprep.subr.bf16.mxu1 %v3175_v52  ;;  %2642 = vmatprep.subr.bf16.mxu0 %v3175_v52  ;;  %v3347_v17 = vpack.c.bf16 %v328_v51, %v321_v12  ;;  %v348_v37 = vsub.f32 %v3247_v29, %v347_v0  ;;  %v180_v7 = vand.u32 4294901760, %v3314_v62  ;;  %v355_v25 = vsub.f32 %v3263_v41, %v354_v42 }
  0x27   :  { %1539 = vperm.xlu1 %2807, %v1407_v3   ;;  %v3287_v3 = vsub.f32 %v47_v57, %v3235_v10  ;;  %v3305_v57 = vpack.c.bf16 %v4161_v34, %v4162_v23  ;;  %4226 = vst [vmem:[#allocation25_spill] sm:$0xff] %v3329_v54  ;;  %v3334_v34 = vsub.f32 %v3057_v16, %v97_v21  ;;  %v1408_v23 = vld [vmem:[%s4153_s4 + $0x20] sm:$0xff]  ;;  %v335_v16 = vand.u32 4294901760, %v334_v1 }
  0x28   :  { %1534 = vperm.xlu0 %2806, %v1406_v4   ;;  %v3289_v4 = vand.u32 4294901760, %v50_v32  ;;  %v4231_v59 = vand.u32 4294901760, %v3182_v55  ;;  %v4232_v62 = vand.u32 4294901760, %v3081_v22  ;;  %v4233_v51 = vand.u32 4294901760, %v3089_v24 }
  0x29   :  { %2548 = vmatpush3.bf16.msra.mxu1 %v3175_v52  ;;  %2644 = vmatpush3.bf16.msra.mxu0 %v3175_v52  ;;  %4222 = vst [vmem:[#allocation21_spill] sm:$0xff] %v3287_v3  ;;  %4225 = vst [vmem:[#allocation24_spill] sm:$0xff] %v3305_v57  ;;  %v4181_v21 = vand.u32 4294901760, %v3287_v3  ;;  %v368_v1 = vand.u32 4294901760, %v3334_v34  ;;  %v4234_v52 = vand.u32 4294901760, %v3293_v58 }
  0x2a   :  { %2550 = vmatprep.subr.bf16.mxu1 %v3231_v5  ;;  %2646 = vmatprep.subr.bf16.mxu0 %v3231_v5  ;;  %4223 = vst [vmem:[#allocation22_spill] sm:$0xff] %v3289_v4  ;;  %4227 = vst [vmem:[#allocation26_spill] sm:$0xff] %v3334_v34  ;;  %v3351_v46 = vsub.f32 %v50_v32, %v3289_v4  ;;  %v3366_v32 = vpack.c.bf16 %v340_v26, %v4231_v59  ;;  %v1394_v26 = vld [vmem:[%s4152_s3 + $0x30] sm:$0xff]  ;;  %v190_v59 = vand.u32 4294901760, %v3326_v48 }
  0x2b   :  { %1447 = vperm.xlu1 %2807, %v1393_v9   ;;  %v52_v9 = vld [vmem:[%s4151_s2 + $0x48] sm:$0xff]  ;;  %v3373_v36 = vsub.f32 %v3081_v22, %v4232_v62  ;;  %v3390_v22 = vsub.f32 %v3287_v3, %v4181_v21  ;;  %v3396_v20 = vsub.f32 %v3089_v24, %v4233_v51  ;;  %v3401_v35 = vsub.f32 %v3293_v58, %v4234_v52 }
  0x2c   :  { %1442 = vperm.xlu0 %2806, %v1392_v13   ;;  %v1409_v13 = vld [vmem:[%s4153_s4 + $0x28] sm:$0xff]  ;;  %4228 = vst [vmem:[#allocation27_spill] sm:$0xff] %v3351_v46  ;;  %v3360_v12 = vand.u32 4294901760, %v52_v9  ;;  %v349_v4 = vand.u32 4294901760, %v348_v37  ;;  %v4235_v48 = vand.u32 4294901760, %v3299_v6  ;;  %v356_v21 = vand.u32 4294901760, %v355_v25 }
  0x2d   :  { %2552 = vmatpush3.bf16.msra.mxu1 %v3231_v5  ;;  %2648 = vmatpush3.bf16.msra.mxu0 %v3231_v5  ;;  %v3358_v5 = vand.u32 4294901760, %v51_v15  ;;  %v3419_v37 = vpack.c.bf16 %v354_v42, %v347_v0  ;;  %v4236_v25 = vand.u32 4294901760, %v3329_v54  ;;  %v4237_v51 = vand.u32 4294901760, %v3351_v46 }
  0x2e   :  { %2554 = vmatprep.subr.bf16.mxu1 %v3256_v33  ;;  %2650 = vmatprep.subr.bf16.mxu0 %v3256_v33  ;;  %4230 = vst [vmem:[#allocation29_spill] sm:$0xff] %v3360_v12  ;;  %v362_v50 = vsub.f32 %v3299_v6, %v4235_v48  ;;  %v3410_v62 = vsub.f32 %v52_v9, %v3360_v12  ;;  %v375_v9 = vand.u32 4294901760, %v3373_v36  ;;  %v382_v0 = vand.u32 4294901760, %v3396_v20  ;;  %v55_v48 = vld [vmem:[%s4151_s2 + $0x60] sm:$0xff] }
  0x2f   :  { %4229 = vst [vmem:[#allocation28_spill] sm:$0xff] %v3358_v5  ;;  %1549 = vperm.xlu1 %2807, %v1409_v13   ;;  %v1395_v13 = vld [vmem:[%s4152_s3 + $0x38] sm:$0xff]  ;;  %v3407_v27 = vsub.f32 %v51_v15, %v3358_v5  ;;  %v3424_v52 = vsub.f32 %v3329_v54, %v4236_v25  ;;  %v369_v15 = vsub.f32 %v3334_v34, %v368_v1  ;;  %v210_v25 = vand.u32 4294901760, %v3401_v35 }
  0x30   :  { %1544 = vperm.xlu0 %2806, %v1408_v23   ;;  %v53_v23 = vld [vmem:[%s4151_s2 + $0x50] sm:$0xff]  ;;  %v3434_v42 = vsub.f32 %v3351_v46, %v4237_v51  ;;  %v4239_v12 = vand.u32 4294901760, %v3139_v40  ;;  %v4240_v5 = vand.u32 4294901760, %v3270_v8  ;;  %v4195_v19 = vand.u32 4294901760, %v3410_v62 }
  0x31   :  { %2556 = vmatpush3.bf16.msra.mxu1 %v3256_v33  ;;  %2652 = vmatpush3.bf16.msra.mxu0 %v3256_v33  ;;  %v2565_v33 = vpack.c.bf16 %v342_v39, %v335_v16  ;;  %v3412_v24 = vand.u32 4294901760, %v53_v23  ;;  %v54_v39 = vld [vmem:[%s4151_s2 + $0x58] sm:$0xff]  ;;  %v200_v16 = vand.u32 4294901760, %v3390_v22  ;;  %v4194_v34 = vand.u32 4294901760, %v3407_v27 }
  0x32   :  { %2558 = vmatprep.subr.bf16.mxu1 %v3305_v57  ;;  %2654 = vmatprep.subr.bf16.mxu0 %v3305_v57  ;;  %v3446_v22 = vand.u32 4294901760, %v54_v39  ;;  %v3451_v51 = vsub.f32 %v3139_v40, %v4239_v12  ;;  %v220_v40 = vand.u32 4294901760, %v3424_v52  ;;  %v3466_v8 = vand.u32 4294901760, %v55_v48 }
  0x33   :  { %1457 = vperm.xlu1 %2807, %v1395_v13   ;;  %v4238_v13 = vand.u32 4294901760, %v3103_v28  ;;  %v3460_v35 = vsub.f32 %v53_v23, %v3412_v24  ;;  %v230_v12 = vand.u32 4294901760, %v3434_v42  ;;  %v4243_v23 = vand.u32 4294901760, %v3146_v43 }
  0x34   :  { %1452 = vperm.xlu0 %2806, %v1394_v26   ;;  %v396_v42 = vand.u32 4294901760, %v3451_v51 }
  0x35   :  { %2560 = vmatpush3.bf16.msra.mxu1 %v3305_v57  ;;  %2656 = vmatpush3.bf16.msra.mxu0 %v3305_v57  ;;  %v3440_v26 = vsub.f32 %v3103_v28, %v4238_v13  ;;  %v363_v57 = vand.u32 4294901760, %v362_v50  ;;  %v4241_v28 = vand.u32 4294901760, %v3158_v47  ;;  %v2569_v13 = vpack.c.bf16 %v356_v21, %v349_v4  ;;  %v56_v4 = vld [vmem:[%s4151_s2 + $0x68] sm:$0xff] }
  0x36   :  { %2562 = vmatprep.subr.bf16.mxu1 %v3347_v17  ;;  %2658 = vmatprep.subr.bf16.mxu0 %v3309_v53  ;;  %v370_v50 = vand.u32 4294901760, %v369_v15  ;;  %v4242_v21 = vand.u32 4294901760, %v3200_v61  ;;  %v3479_v52 = vsub.f32 %v3146_v43, %v4243_v23  ;;  %v4244_v15 = vand.u32 4294901760, %v3299_v6  ;;  %v57_v43 = vld [vmem:[%s4151_s2 + $0x70] sm:$0xff] }
  0x37   :  { %v4246_v23 = vand.u32 4294901760, %v3217_v2  ;;  %v3510_v2 = vpack.c.bf16 %v382_v0, %v375_v9  ;;  %v4260_v61 = vand.u32 4294901760, %v3440_v26 }
  0x38   :  { %2226 = vmatmul.mubr.f32.vlgmr.msra.gmra.mrb[0].mxu1 %v4240_v5  ;;  %2394 = vmatmul.mubr.f32.vlgmr.msra.gmra.mrb[0].mxu0 %v4241_v28  ;;  %v376_v5 = vsub.f32 %v3373_v36, %v375_v9  ;;  %v3485_v28 = vsub.f32 %v54_v39, %v3446_v22  ;;  %v3504_v39 = vsub.f32 %v3410_v62, %v4195_v19  ;;  %v4248_v19 = vand.u32 4294901760, %v3287_v3 }
  0x39   :  { %2564 = vmatpush3.bf16.msra.mxu1 %v3347_v17  ;;  %2660 = vmatpush3.bf16.msra.mxu0 %v3309_v53  ;;  %v383_v17 = vsub.f32 %v3396_v20, %v382_v0  ;;  %v3524_v9 = vand.u32 4294901760, %v57_v43  ;;  %v397_v0 = vsub.f32 %v3451_v51, %v396_v42  ;;  %v1362_v3 = vlaneseq }
  0x3a   :  { %2228 = vmatprep.mubr.f32.mxu1 %v180_v7  ;;  %2396 = vmatprep.mubr.f32.mxu0 %v4242_v21  ;;  %v2669_v7 = vpack.c.bf16 %v368_v1, %v4244_v15  ;;  %v4245_v21 = vand.u32 4294901760, %v3155_v45  ;;  %v239_v1 = vsub.f32 %v3407_v27, %v4194_v34  ;;  %v3507_v15 = vand.u32 4294901760, %v56_v4  ;;  %v58_v34 = vld [vmem:[%s4151_s2 + $0x78] sm:$0xff] }
  0x3b   :  { %2566 = vmatprep.subr.bf16.mxu1 %v2565_v33  ;;  %2662 = vmatprep.subr.bf16.mxu0 %v3366_v32 }
  0x3c   :  { %v3491_v53 = vsub.f32 %v3155_v45, %v4245_v21  ;;  %2229 = vmatmul.mubr.f32.gmra.mrb[2].mxu1 %v190_v59  ;;  %2397 = vmatmul.mubr.f32.gmra.mrb[2].mxu0 %v4246_v23  ;;  %v2573_v59 = vpack.c.bf16 %v370_v50, %v363_v57  ;;  %v377_v21 = vand.u32 4294901760, %v376_v5  ;;  %v3513_v23 = vsub.f32 %v55_v48, %v3466_v8 }
  0x3d   :  { %2568 = vmatpush3.bf16.msra.mxu1 %v2565_v33  ;;  %2664 = vmatpush3.bf16.msra.mxu0 %v3366_v32  ;;  %v384_v45 = vand.u32 4294901760, %v383_v17  ;;  %v4249_v33 = vand.u32 4294901760, %v3440_v26  ;;  %v4251_v50 = vand.u32 4294901760, %v3210_v63  ;;  %v4252_v17 = vand.u32 4294901760, %v3293_v58 }
  0x3e   :  { %4247 = vst [vmem:[#allocation30_spill] sm:$0xff] %v3513_v23  ;;  %2231 = vmatprep.mubr.f32.mxu1 %v200_v16  ;;  %2399 = vmatprep.mubr.f32.mxu0 %v4248_v19  ;;  %v4250_v16 = vand.u32 4294901760, %v3197_v60  ;;  %v3543_v57 = vsub.f32 %v56_v4, %v3507_v15  ;;  %v3545_v48 = vand.u32 4294901760, %v58_v34  ;;  %v4255_v58 = vand.u32 4294901760, %v3479_v52 }
  0x3f   :  { %v390_v32 = vsub.f32 %v3440_v26, %v4249_v33  ;;  %2570 = vmatprep.subr.bf16.mxu1 %v2569_v13  ;;  %2666 = vmatprep.subr.bf16.mxu0 %v3419_v37  ;;  %v3537_v5 = vsub.f32 %v3210_v63, %v4251_v50  ;;  %v4253_v63 = vand.u32 4294901760, %v3460_v35  ;;  %v278_v50 = vand.u32 4294901760, %v3513_v23 }
  0x40   :  { %v3532_v19 = vsub.f32 %v3197_v60, %v4250_v16  ;;  %2232 = vmatmul.mubr.f32.gmra.mrb[4].mxu1 %v210_v25  ;;  %2400 = vmatmul.mubr.f32.gmra.mrb[4].mxu0 %v4252_v17  ;;  %v240_v60 = vand.u32 4294901760, %v239_v1  ;;  %v250_v16 = vand.u32 4294901760, %v3504_v39  ;;  %v4254_v17 = vand.u32 4294901760, %v3329_v54 }
  0x41   :  { %2572 = vmatpush3.bf16.msra.mxu1 %v2569_v13  ;;  %2668 = vmatpush3.bf16.msra.mxu0 %v3419_v37  ;;  %v259_v25 = vsub.f32 %v3460_v35, %v4253_v63  ;;  %v2577_v4 = vpack.c.bf16 %v384_v45, %v377_v21  ;;  %v391_v33 = vand.u32 4294901760, %v390_v32  ;;  %v404_v13 = vsub.f32 %v3479_v52, %v4255_v58  ;;  %v3566_v45 = vld [vmem:[#allocation4] sm:$0x1] }
  0x42   :  { %2234 = vmatprep.mubr.f32.mxu1 %v220_v40  ;;  %2402 = vmatprep.mubr.f32.mxu0 %v4254_v17  ;;  %v3559_v37 = vsub.f32 %v57_v43, %v3524_v9  ;;  %v398_v1 = vand.u32 4294901760, %v397_v0  ;;  %v4256_v39 = vand.u32 4294901760, %v3491_v53  ;;  %v417_v40 = vand.u32 4294901760, %v3532_v19 }
  0x43   :  { %2574 = vmatprep.subr.bf16.mxu1 %v2573_v59  ;;  %2670 = vmatprep.subr.bf16.mxu0 %v2669_v7  ;;  %v424_v17 = vand.u32 4294901760, %v3537_v5  ;;  %v4257_v21 = vand.u32 4294901760, %v3351_v46  ;;  %v4258_v58 = vand.u32 4294901760, %v3485_v28  ;;  %v288_v32 = vand.u32 4294901760, %v3543_v57 }
  0x44   :  { %v411_v63 = vsub.f32 %v3491_v53, %v4256_v39  ;;  %2235 = vmatmul.mubr.f32.gmra.mrb[6].mxu1 %v230_v12  ;;  %v3575_v0 = vsub.f32 %v58_v34, %v3545_v48  ;;  %v3577_v39 = vshrl.u32 %v1362_v3, 7  ;;  %v260_v54 = vand.u32 4294901760, %v259_v25 }
  0x45   :  { %2403 = vmatmul.mubr.f32.gmra.mrb[6].mxu0 %v4257_v21  ;;  %v269_v43 = vsub.f32 %v3485_v28, %v4258_v58  ;;  %2576 = vmatpush3.bf16.msra.mxu1 %v2573_v59  ;;  %v2677_v12 = vpack.c.bf16 %v396_v42, %v4260_v61  ;;  %v279_v46 = vsub.f32 %v3513_v23, %v278_v50  ;;  %v4261_v21 = vand.u32 4294901760, %v3407_v27 }
  0x46   :  { %4259 = vst [vmem:[#allocation31_spill] sm:$0xff] %v3577_v39  ;;  %2672 = vmatpush3.bf16.msra.mxu0 %v2669_v7  ;;  %2237 = vmatprep.mubr.f32.mxu1 %v240_v60  ;;  %v405_v58 = vand.u32 4294901760, %v404_v13  ;;  %v298_v47 = vand.u32 4294901760, %v3559_v37  ;;  %v4204_v34 = vsub.s32 0, %v3577_v39  ;;  %v4205_v3 = vmax.f32 %v3566_v45, 1e-10 }
  0x47   :  { %2405 = vmatprep.mubr.f32.mxu0 %v4261_v21  ;;  %2578 = vmatprep.subr.bf16.mxu1 %v2577_v4  ;;  %v2581_v7 = vpack.c.bf16 %v398_v1, %v391_v33  ;;  %v412_v59 = vand.u32 4294901760, %v411_v63  ;;  %v418_v61 = vsub.f32 %v3532_v19, %v417_v40  ;;  %v425_v42 = vsub.f32 %v3537_v5, %v424_v17 }
  0x48   :  { %2674 = vmatprep.subr.bf16.mxu0 %v3510_v2  ;;  %2238 = vmatmul.mubr.f32.gmra.mrb[8].mxu1 %v250_v16  ;;  %v4262_v60 = vand.u32 4294901760, %v3410_v62  ;;  %v270_v25 = vand.u32 4294901760, %v269_v43  ;;  %v289_v13 = vsub.f32 %v3543_v57, %v288_v32  ;;  %v308_v21 = vand.u32 4294901760, %v3575_v0 }
  0x49   :  { %v3598_v23 = vrot.slane %v4205_v3, %v4204_v34  ;;  %2580 = vmatpush3.bf16.msra.mxu1 %v2577_v4  ;;  %2240 = vmatprep.mubr.f32.mxu1 %v260_v54  ;;  %v4263_v33 = vand.u32 4294901760, %v3460_v35  ;;  %v280_v16 = vand.u32 4294901760, %v279_v46  ;;  %v299_v1 = vsub.f32 %v3559_v37, %v298_v47 }
  0x4a   :  { %2406 = vmatmul.mubr.f32.gmra.mrb[8].mxu0 %v4262_v60  ;;  %2582 = vmatprep.subr.bf16.mxu1 %v2581_v7  ;;  %v2585_v63 = vpack.c.bf16 %v412_v59, %v405_v58  ;;  %v4264_v43 = vand.u32 4294901760, %v3479_v52  ;;  %v4265_v60 = vand.u32 4294901760, %v3491_v53  ;;  %v419_v34 = vand.u32 4294901760, %v418_v61 }
  0x4b   :  { %2676 = vmatpush3.bf16.msra.mxu0 %v3510_v2  ;;  %2408 = vmatprep.mubr.f32.mxu0 %v4263_v33  ;;  %v426_v3 = vand.u32 4294901760, %v425_v42  ;;  %v4266_v2 = vand.u32 4294901760, %v3485_v28  ;;  %v290_v54 = vand.u32 4294901760, %v289_v13  ;;  %v309_v4 = vsub.f32 %v3575_v0, %v308_v21  ;;  %v1399_v42 = vld [vmem:[%s4152_s3 + $0x58] sm:$0xff]  ;;  %v1401_v33 = vld [vmem:[%s4152_s3 + $0x68] sm:$0xff] }
  0x4c   :  { %2678 = vmatprep.subr.bf16.mxu0 %v2677_v12  ;;  %v2681_v39 = vpack.c.bf16 %v4265_v60, %v4264_v43  ;;  %2241 = vmatmul.mubr.f32.gmra.mrb[10].mxu1 %v270_v25  ;;  %v300_v46 = vand.u32 4294901760, %v299_v1  ;;  %v2685_v59 = vpack.c.bf16 %v424_v17, %v417_v40  ;;  %v1397_v40 = vld [vmem:[%s4152_s3 + $0x48] sm:$0xff]  ;;  %v2617_v25 = vpack.c.bf16 %v3491_v53, %v3479_v52  ;;  %v1415_v13 = vld [vmem:[%s4153_s4 + $0x58] sm:$0xff]  ;;  %v1414_v53 = vld [vmem:[%s4153_s4 + $0x50] sm:$0xff] }
  0x4d   :  { %2584 = vmatpush3.bf16.msra.mxu1 %v2581_v7  ;;  %2243 = vmatprep.mubr.f32.mxu1 %v280_v16  ;;  %v2589_v58 = vpack.c.bf16 %v426_v3, %v419_v34  ;;  %v310_v61 = vand.u32 4294901760, %v309_v4  ;;  %v2593_v7 = vpack.c.bf16 %v3131_v38, %v3110_v31  ;;  %v2601_v31 = vpack.c.bf16 %v3263_v41, %v3247_v29  ;;  %v1411_v38 = vld [vmem:[%s4153_s4 + $0x38] sm:$0xff]  ;;  %v4270_v29 = vld [vmem:[#allocation20_spill] sm:$0xff]  ;;  %v4280_v43 = vld [vmem:[#allocation13_spill] sm:$0xff] }
  0x4e   :  { %2409 = vmatmul.mubr.f32.gmra.mrb[10].mxu0 %v4266_v2  ;;  %2586 = vmatprep.subr.bf16.mxu1 %v2585_v63  ;;  %v4271_v41 = vld [vmem:[#allocation22_spill] sm:$0xff]  ;;  %v4272_v17 = vld [vmem:[#allocation12_spill] sm:$0xff]  ;;  %v2613_v3 = vpack.c.bf16 %v3451_v51, %v3440_v26  ;;  %v4276_v51 = vld [vmem:[#allocation17_spill] sm:$0xff] }
  0x4f   :  { %2680 = vmatpush3.bf16.msra.mxu0 %v2677_v12  ;;  %2411 = vmatprep.mubr.f32.mxu0 %v278_v50  ;;  %v2597_v50 = vpack.c.bf16 %v3187_v56, %v3182_v55  ;;  %v4268_v55 = vld [vmem:[#allocation18_spill] sm:$0xff]  ;;  %v4274_v12 = vld [vmem:[#allocation29_spill] sm:$0xff]  ;;  %v4277_v52 = vld [vmem:[#allocation19_spill] sm:$0xff] }
  0x50   :  { %2682 = vmatprep.subr.bf16.mxu0 %v2681_v39  ;;  %2244 = vmatmul.mubr.f32.gmra.mrb[12].mxu1 %v290_v54  ;;  %v1413_v34 = vld [vmem:[%s4153_s4 + $0x48] sm:$0xff]  ;;  %v1398_v26 = vld [vmem:[%s4152_s3 + $0x50] sm:$0xff]  ;;  %v4279_v16 = vld [vmem:[#allocation11_spill] sm:$0xff] }
  0x51   :  { %2588 = vmatpush3.bf16.msra.mxu1 %v2585_v63  ;;  %2246 = vmatprep.mubr.f32.mxu1 %v300_v46  ;;  %v1417_v1 = vld [vmem:[%s4153_s4 + $0x68] sm:$0xff]  ;;  %v1416_v63 = vld [vmem:[%s4153_s4 + $0x60] sm:$0xff]  ;;  %v1403_v54 = vld [vmem:[%s4152_s3 + $0x78] sm:$0xff] }
  0x52   :  { %2412 = vmatmul.mubr.f32.gmra.mrb[12].mxu0 %v288_v32  ;;  %2590 = vmatprep.subr.bf16.mxu1 %v2589_v58  ;;  %v2609_v32 = vpack.c.bf16 %v3396_v20, %v3373_v36  ;;  %v1412_v36 = vld [vmem:[%s4153_s4 + $0x40] sm:$0xff]  ;;  %v4275_v20 = vld [vmem:[#allocation14_spill] sm:$0xff] }
  0x53   :  { %2684 = vmatpush3.bf16.msra.mxu0 %v2681_v39  ;;  %2414 = vmatprep.mubr.f32.mxu0 %v298_v47  ;;  %v1410_v47 = vld [vmem:[%s4153_s4 + $0x30] sm:$0xff]  ;;  %v4273_v39 = vld [vmem:[#allocation28_spill] sm:$0xff]  ;;  %v4281_v60 = vld [vmem:[#allocation15_spill] sm:$0xff] }
  0x54   :  { %2686 = vmatprep.subr.bf16.mxu0 %v2685_v59  ;;  %2247 = vmatmul.mubr.f32.gmra.mrb[14].mxu1 %v310_v61  ;;  %v1402_v4 = vld [vmem:[%s4152_s3 + $0x70] sm:$0xff]  ;;  %v4283_v46 = vld [vmem:[#allocation16_spill] sm:$0xff] }
  0x55   :  { %2592 = vmatpush3.bf16.msra.mxu1 %v2589_v58  ;;  %2281 = vmatprep.mubr.f32.mxu1 %v3066_v18  ;;  %v1418_v58 = vld [vmem:[%s4153_s4 + $0x70] sm:$0xff] }
  0x56   :  { %2415 = vmatmul.mubr.f32.gmra.mrb[14].mxu0 %v308_v21  ;;  %2594 = vmatprep.subr.bf16.mxu1 %v2593_v7  ;;  %v2621_v21 = vpack.c.bf16 %v3537_v5, %v3532_v19  ;;  %v1400_v19 = vld [vmem:[%s4152_s3 + $0x60] sm:$0xff] }
  0x57   :  { %2688 = vmatpush3.bf16.msra.mxu0 %v2685_v59  ;;  %2449 = vmatprep.mubr.f32.mxu0 %v3066_v18  ;;  %v4278_v5 = vld [vmem:[#allocation24_spill] sm:$0xff]  ;;  %v4285_v59 = vld [vmem:[#allocation23_spill] sm:$0xff] }
  0x58   :  { %2690 = vmatprep.subr.bf16.mxu0 %v3039_v11  ;;  %2282 = vmatmul.mubr.f32.vlgmr.msra.gmra.mrb[0].mxu1 %v3108_v30 }
  0x59   :  { %2596 = vmatpush3.bf16.msra.mxu1 %v2593_v7  ;;  %2284 = vmatprep.mubr.f32.mxu1 %v3148_v44  ;;  %v4288_v7 = vld [vmem:[#allocation30_spill] sm:$0xff] }
  0x5a   :  { %2450 = vmatmul.mubr.f32.vlgmr.msra.gmra.mrb[0].mxu0 %v3108_v30  ;;  %2598 = vmatprep.subr.bf16.mxu1 %v2597_v50 }
  0x5b   :  { %2692 = vmatpush3.bf16.msra.mxu0 %v3039_v11  ;;  %2452 = vmatprep.mubr.f32.mxu0 %v3148_v44  ;;  %v4267_v11 = vld [vmem:[#allocation10_spill] sm:$0xff] }
  0x5c   :  { %2694 = vmatprep.subr.bf16.mxu0 %v3047_v14  ;;  %2285 = vmatmul.mubr.f32.gmra.mrb[2].mxu1 %v3161_v49 }
  0x5d   :  { %2600 = vmatpush3.bf16.msra.mxu1 %v2597_v50  ;;  %2287 = vmatprep.mubr.f32.mxu1 %v3235_v10 }
  0x5e   :  { %2453 = vmatmul.mubr.f32.gmra.mrb[2].mxu0 %v3161_v49  ;;  %2602 = vmatprep.subr.bf16.mxu1 %v2601_v31 }
  0x5f   :  { %2696 = vmatpush3.bf16.msra.mxu0 %v3047_v14  ;;  %2455 = vmatprep.mubr.f32.mxu0 %v3235_v10  ;;  %v4269_v14 = vld [vmem:[#allocation26_spill] sm:$0xff] }
  0x60   :  { %2698 = vmatprep.subr.bf16.mxu0 %v4267_v11  ;;  %2288 = vmatmul.mubr.f32.gmra.mrb[4].mxu1 %v4268_v55  ;;  %v2605_v56 = vpack.c.bf16 %v4269_v14, %v3299_v6  ;;  %v1396_v6 = vld [vmem:[%s4152_s3 + $0x40] sm:$0xff] }
  0x61   :  { %2604 = vmatpush3.bf16.msra.mxu1 %v2601_v31  ;;  %1559 = vperm.xlu1 %2807, %v1411_v38  }
  0x62   :  { %2456 = vmatmul.mubr.f32.gmra.mrb[4].mxu0 %v4268_v55  ;;  %1554 = vperm.xlu0 %2806, %v1410_v47  }
  0x63   :  { %2700 = vmatpush3.bf16.msra.mxu0 %v4267_v11  ;;  %2290 = vmatprep.mubr.f32.mxu1 %v4270_v29 }
  0x64   :  { %2458 = vmatprep.mubr.f32.mxu0 %v4270_v29  ;;  %2291 = vmatmul.mubr.f32.gmra.mrb[6].mxu1 %v4271_v41 }
  0x65   :  { %2606 = vmatprep.subr.bf16.mxu1 %v2605_v56  ;;  %2702 = vmatprep.subr.bf16.mxu0 %v4272_v17 }
  0x66   :  { %2459 = vmatmul.mubr.f32.gmra.mrb[6].mxu0 %v4271_v41  ;;  %2608 = vmatpush3.bf16.msra.mxu1 %v2605_v56 }
  0x67   :  { %2704 = vmatpush3.bf16.msra.mxu0 %v4272_v17  ;;  %1467 = vperm.xlu1 %2807, %v1397_v40  }
  0x68   :  { %1462 = vperm.xlu0 %2806, %v1396_v6   ;;  %2293 = vmatprep.mubr.f32.mxu1 %v4273_v39 }
  0x69   :  { %2461 = vmatprep.mubr.f32.mxu0 %v4273_v39  ;;  %2294 = vmatmul.mubr.f32.gmra.mrb[8].mxu1 %v4274_v12 }
  0x6a   :  { %2610 = vmatprep.subr.bf16.mxu1 %v2609_v32  ;;  %2462 = vmatmul.mubr.f32.gmra.mrb[8].mxu0 %v4274_v12 }
  0x6b   :  { %2706 = vmatprep.subr.bf16.mxu0 %v4275_v20  ;;  %2612 = vmatpush3.bf16.msra.mxu1 %v2609_v32 }
  0x6c   :  { %2708 = vmatpush3.bf16.msra.mxu0 %v4275_v20  ;;  %1569 = vperm.xlu1 %2807, %v1413_v34  }
  0x6d   :  { %1564 = vperm.xlu0 %2806, %v1412_v36   ;;  %2296 = vmatprep.mubr.f32.mxu1 %v3412_v24 }
  0x6e   :  { %2464 = vmatprep.mubr.f32.mxu0 %v3412_v24  ;;  %2297 = vmatmul.mubr.f32.gmra.mrb[10].mxu1 %v3446_v22 }
  0x6f   :  { %2614 = vmatprep.subr.bf16.mxu1 %v2613_v3  ;;  %2465 = vmatmul.mubr.f32.gmra.mrb[10].mxu0 %v3446_v22 }
  0x70   :  { %2710 = vmatprep.subr.bf16.mxu0 %v4276_v51  ;;  %2616 = vmatpush3.bf16.msra.mxu1 %v2613_v3  ;;  %v2810_v3 = vld [vmem:[%s4154_s5 + $0x4] ss:$8 sps:$4 sm:$0xff]  }
  0x71   :  { %2712 = vmatpush3.bf16.msra.mxu0 %v4276_v51  ;;  %1477 = vperm.xlu1 %2807, %v1399_v42  }
  0x72   :  { %1472 = vperm.xlu0 %2806, %v1398_v26   ;;  %2299 = vmatprep.mubr.f32.mxu1 %v3466_v8 }
  0x73   :  { %2467 = vmatprep.mubr.f32.mxu0 %v3466_v8  ;;  %2300 = vmatmul.mubr.f32.gmra.mrb[12].mxu1 %v3507_v15 }
  0x74   :  { %2618 = vmatprep.subr.bf16.mxu1 %v2617_v25  ;;  %2468 = vmatmul.mubr.f32.gmra.mrb[12].mxu0 %v3507_v15 }
  0x75   :  { %2714 = vmatprep.subr.bf16.mxu0 %v4277_v52  ;;  %2620 = vmatpush3.bf16.msra.mxu1 %v2617_v25 }
  0x76   :  { %2716 = vmatpush3.bf16.msra.mxu0 %v4277_v52  ;;  %1579 = vperm.xlu1 %2807, %v1415_v13  }
  0x77   :  { %1574 = vperm.xlu0 %2806, %v1414_v53   ;;  %2302 = vmatprep.mubr.f32.mxu1 %v3524_v9 }
  0x78   :  { %2470 = vmatprep.mubr.f32.mxu0 %v3524_v9  ;;  %2303 = vmatmul.mubr.f32.gmra.mrb[14].mxu1 %v3545_v48 }
  0x79   :  { %2622 = vmatprep.subr.bf16.mxu1 %v2621_v21  ;;  %2471 = vmatmul.mubr.f32.gmra.mrb[14].mxu0 %v3545_v48 }
  0x7a   :  { %2718 = vmatprep.subr.bf16.mxu0 %v4278_v5  ;;  %2624 = vmatpush3.bf16.msra.mxu1 %v2621_v21 }
  0x7b   :  { %2720 = vmatpush3.bf16.msra.mxu0 %v4278_v5  ;;  %1487 = vperm.xlu1 %2807, %v1401_v33  }
  0x7c   :  { %1482 = vperm.xlu0 %2806, %v1400_v19   ;;  %2337 = vmatprep.mubr.f32.mxu1 %v4279_v16 }
  0x7d   :  { %2505 = vmatprep.mubr.f32.mxu0 %v3066_v18  ;;  %2338 = vmatmul.mubr.f32.vlgmr.msra.gmra.mrb[0].mxu1 %v4280_v43  ;;  %v4282_v18 = vmax.f32 %v3566_v45, 1e-10  ;;  %v1419_v45 = vld [vmem:[%s4153_s4 + $0x78] sm:$0xff] }
  0x7e   :  { %2506 = vmatmul.mubr.f32.vlgmr.msra.gmra.mrb[0].mxu0 %v3108_v30  ;;  %2340 = vmatprep.mubr.f32.mxu1 %v4281_v60  ;;  %v4284_v30 = vld [vmem:[#allocation21_spill] sm:$0xff] }
  0x7f   :  { %2508 = vmatprep.mubr.f32.mxu0 %v3148_v44  ;;  %1589 = vperm.xlu1 %2807, %v1417_v1   ;;  %v1384_v2 = vmul.f32 0.1, %v4282_v18 }
  0x80   :  { %1584 = vperm.xlu0 %2806, %v1416_v63  }
  0x81   :  { %2341 = vmatmul.mubr.f32.gmra.mrb[2].mxu1 %v4283_v46  ;;  %v1385_v44 = vadd.f32 1.8, %v1384_v2 }
  0x82   :  { %2509 = vmatmul.mubr.f32.gmra.mrb[2].mxu0 %v3161_v49  ;;  %2343 = vmatprep.mubr.f32.mxu1 %v4284_v30  ;;  %v4286_v49 = vld [vmem:[#allocation25_spill] sm:$0xff] }
  0x83   :  { %2511 = vmatprep.mubr.f32.mxu0 %v3235_v10  ;;  %1497 = vperm.xlu1 %2807, %v1403_v54   ;;  %2811 = vrcp.f32 %v1385_v44  ;;  %v4287_v10 = vld [vmem:[#allocation27_spill] sm:$0xff] }
  0x84   :  { %1492 = vperm.xlu0 %2806, %v1402_v4  }
  0x85   :  { %2344 = vmatmul.mubr.f32.gmra.mrb[4].mxu1 %v4285_v59 }
  0x86   :  { %2512 = vmatmul.mubr.f32.gmra.mrb[4].mxu0 %v4268_v55  ;;  %2346 = vmatprep.mubr.f32.mxu1 %v4286_v49 }
  0x87   :  { %2514 = vmatprep.mubr.f32.mxu0 %v4270_v29  ;;  %1599 = vperm.xlu1 %2807, %v1419_v45  }
  0x88   :  { %1594 = vperm.xlu0 %2806, %v1418_v58  }
  0x89   :  { %2347 = vmatmul.mubr.f32.gmra.mrb[6].mxu1 %v4287_v10 }
  0x8a   :  { %2515 = vmatmul.mubr.f32.gmra.mrb[6].mxu0 %v4271_v41  ;;  %2349 = vmatprep.mubr.f32.mxu1 %v3407_v27 }
  0x8b   :  { %2517 = vmatprep.mubr.f32.mxu0 %v4273_v39 }
  0x8d   :  { %2350 = vmatmul.mubr.f32.gmra.mrb[8].mxu1 %v3410_v62  ;;  %v2812_v61 = vpop.eup %2811  ;;  %v4289_v62 = vld [vmem:[#allocation31_spill] sm:$0xff] }
  0x8e   :  { %2518 = vmatmul.mubr.f32.gmra.mrb[8].mxu0 %v4274_v12  ;;  %2352 = vmatprep.mubr.f32.mxu1 %v3460_v35  ;;  %v1387_v27 = vmul.f32 1.9, %v2812_v61 }
  0x8f   :  { %2520 = vmatprep.mubr.f32.mxu0 %v3412_v24  ;;  %v4290_v24 = vsub.s32 0, %v4289_v62 }
  0x91   :  { %2353 = vmatmul.mubr.f32.gmra.mrb[10].mxu1 %v3485_v28  ;;  %v3763_v35 = vrot.slane %v1387_v27, %v4290_v24 }
  0x92   :  { %2521 = vmatmul.mubr.f32.gmra.mrb[10].mxu0 %v3446_v22  ;;  %2355 = vmatprep.mubr.f32.mxu1 %v4288_v7 }
  0x93   :  { %2523 = vmatprep.mubr.f32.mxu0 %v3466_v8 }
  0x95   :  { %2356 = vmatmul.mubr.f32.gmra.mrb[12].mxu1 %v3543_v57 }
  0x96   :  { %2524 = vmatmul.mubr.f32.gmra.mrb[12].mxu0 %v3507_v15  ;;  %2358 = vmatprep.mubr.f32.mxu1 %v3559_v37 }
  0x97   :  { %2526 = vmatprep.mubr.f32.mxu0 %v3524_v9 }
  0x99   :  { %2359 = vmatmul.mubr.f32.gmra.mrb[14].mxu1 %v3575_v0 }
  0x9a   :  { %2527 = vmatmul.mubr.f32.gmra.mrb[14].mxu0 %v3545_v48  ;;  %v1525_v22 = vpop.permute.xlu1 %1524  ;;  %v1423_v28 = vpop.permute.xlu0 %1422  ;;  %1948 = vmatprep.mubr.bf16.mxu1 %v2810_v3 }
  0x9b   :  { %v1506_v8 = vmul.f32 %v3763_v35, %v1423_v28 }
  0x9d   :  { %v1602_v50 = vadd.f32 %v1525_v22, %v1506_v8 }
  0x9e   :  { %v1530_v37 = vpop.permute.xlu1 %1529 }
  0x9f   :  { %v1428_v57 = vpop.permute.xlu0 %1427  ;;  %2813 = vrcp.f32 %v1602_v50 }
  0xa0   :  { %v1507_v15 = vmul.f32 %v3763_v35, %v1428_v57 }
  0xa2   :  { %v1603_v31 = vadd.f32 %v1530_v37, %v1507_v15  ;;  %v3781_v17 = vpop.permute.xlu1 %1437 }
  0xa3   :  { %v3783_v32 = vpop.permute.xlu0 %1432  ;;  %v1509_v33 = vmul.f32 %v3763_v35, %v3781_v17 }
  0xa4   :  { %2815 = vrcp.f32 %v1603_v31  ;;  %v1508_v5 = vmul.f32 %v3763_v35, %v3783_v32 }
  0xa6   :  { %v1540_v39 = vpop.permute.xlu1 %1539 }
  0xa7   :  { %v1535_v12 = vpop.permute.xlu0 %1534  ;;  %v1605_v1 = vadd.f32 %v1540_v39, %v1509_v33 }
  0xa8   :  { %v1604_v18 = vadd.f32 %v1535_v12, %v1508_v5 }
  0xa9   :  { %v2814_v9 = vpop.eup %2813 }
  0xaa   :  { %v3769_v11 = vmul.f32 %v2814_v9, %v1525_v22  ;;  %v3785_v34 = vpop.permute.xlu1 %1447 }
  0xab   :  { %v3787_v36 = vpop.permute.xlu0 %1442  ;;  %v1511_v16 = vmul.f32 %v3763_v35, %v3785_v34 }
  0xac   :  { %v1666_v38 = vmul.f32 %v3769_v11, %v1506_v8  ;;  %v1510_v63 = vmul.f32 %v3763_v35, %v3787_v36 }
  0xae   :  { %v2816_v0 = vpop.eup %2815  ;;  %v1682_v47 = vadd.f32 %v1666_v38, %v1423_v28  ;;  %v1550_v20 = vpop.permute.xlu1 %1549 }
  0xaf   :  { %v3772_v48 = vmul.f32 %v2816_v0, %v1530_v37  ;;  %v1545_v42 = vpop.permute.xlu0 %1544  ;;  %v1607_v54 = vadd.f32 %v1550_v20, %v1511_v16 }
  0xb0   :  { %2817 = vrcp.f32 %v1682_v47  ;;  %v1606_v30 = vadd.f32 %v1545_v42, %v1510_v63 }
  0xb1   :  { %v1667_v55 = vmul.f32 %v3772_v48, %v1507_v15 }
  0xb2   :  { %v3792_v26 = vpop.permute.xlu1 %1457 }
  0xb3   :  { %v1683_v14 = vadd.f32 %v1667_v55, %v1428_v57  ;;  %v3794_v51 = vpop.permute.xlu0 %1452  ;;  %v1513_v43 = vmul.f32 %v3763_v35, %v3792_v26 }
  0xb4   :  { %v1512_v2 = vmul.f32 %v3763_v35, %v3794_v51 }
  0xb5   :  { %2819 = vrcp.f32 %v1683_v14 }
  0xb6   :  { %2821 = vrcp.f32 %v1605_v1 }
  0xb7   :  { %2823 = vrcp.f32 %v1604_v18 }
  0xb8   :  { %2825 = vrcp.f32 %v1607_v54 }
  0xb9   :  { %2827 = vrcp.f32 %v1606_v30 }
  0xba   :  { %v3775_v56 = vpop.eup %2817 }
  0xbb   :  { %v1762_v29 = vmul.f32 -0.5, %v3775_v56 }
  0xbf   :  { %v3778_v41 = vpop.eup %2819 }
  0xc0   :  { %v1763_v40 = vmul.f32 -0.5, %v3778_v41  ;;  %v2822_v24 = vpop.eup %2821 }
  0xc1   :  { %v2824_v8 = vpop.eup %2823  ;;  %v3835_v57 = vmul.f32 %v2822_v24, %v1540_v39 }
  0xc2   :  { %v1778_v6 = vpack.c.bf16 %v1763_v40, %v1762_v29  ;;  %v2826_v50 = vpop.eup %2825  ;;  %v3839_v9 = vmul.f32 %v2824_v8, %v1535_v12 }
  0xc3   :  { %v2828_v37 = vpop.eup %2827  ;;  %v3847_v55 = vmul.f32 %v2826_v50, %v1550_v20  ;;  %v1669_v29 = vmul.f32 %v3835_v57, %v1509_v33 }
  0xc4   :  { %2171 = vmatprep.subr.bf16.mxu1 %v1778_v6  ;;  %v3850_v40 = vmul.f32 %v2828_v37, %v1545_v42  ;;  %v1668_v1 = vmul.f32 %v3839_v9, %v1508_v5 }
  0xc5   :  { %v1671_v42 = vmul.f32 %v3847_v55, %v1511_v16  ;;  %v1685_v54 = vadd.f32 %v1669_v29, %v3781_v17 }
  0xc6   :  { %v1684_v5 = vadd.f32 %v1668_v1, %v3783_v32 }
  0xc7   :  { %v1687_v17 = vadd.f32 %v1671_v42, %v3785_v34 }
  0xe0   :  { %v1560_v25 = vpop.permute.xlu1 %1559 }
  0xe1   :  { %v1555_v13 = vpop.permute.xlu0 %1554  ;;  %v1609_v45 = vadd.f32 %v1560_v25, %v1513_v43 }
  0xe2   :  { %v1608_v58 = vadd.f32 %v1555_v13, %v1512_v2 }
  0xe3   :  { %2829 = vrcp.f32 %v1609_v45 }
  0xe4   :  { %2831 = vrcp.f32 %v1608_v58 }
  0xe6   :  { %v3796_v53 = vpop.permute.xlu1 %1467 }
  0xe7   :  { %v3798_v52 = vpop.permute.xlu0 %1462  ;;  %v1515_v4 = vmul.f32 %v3763_v35, %v3796_v53 }
  0xe8   :  { %v1514_v44 = vmul.f32 %v3763_v35, %v3798_v52 }
  0xeb   :  { %v1570_v21 = vpop.permute.xlu1 %1569 }
  0xec   :  { %v1565_v19 = vpop.permute.xlu0 %1564  ;;  %v1611_v59 = vadd.f32 %v1570_v21, %v1515_v4 }
  0xed   :  { %v1610_v10 = vadd.f32 %v1565_v19, %v1514_v44  ;;  %v2830_v31 = vpop.eup %2829 }
  0xee   :  { %2833 = vrcp.f32 %v1611_v59  ;;  %v2832_v47 = vpop.eup %2831  ;;  %v3854_v12 = vmul.f32 %v2830_v31, %v1560_v25  ;;  %v1670_v25 = vmul.f32 %v3850_v40, %v1510_v63 }
  0xef   :  { %2835 = vrcp.f32 %v1610_v10  ;;  %v3861_v18 = vmul.f32 %v2832_v47, %v1555_v13 }
  0xf0   :  { %v3810_v60 = vpop.permute.xlu1 %1477  ;;  %v1673_v58 = vmul.f32 %v3854_v12, %v1513_v43  ;;  %v1686_v63 = vadd.f32 %v1670_v25, %v3787_v36 }
  0xf1   :  { %v3816_v46 = vpop.permute.xlu0 %1472  ;;  %v3824_v7 = vmul.f32 %v3763_v35, %v3810_v60  ;;  %v1672_v59 = vmul.f32 %v3861_v18, %v1512_v2 }
  0xf2   :  { %v3828_v27 = vmul.f32 %v3763_v35, %v3816_v46  ;;  %v1689_v10 = vadd.f32 %v1673_v58, %v3792_v26 }
  0xf5   :  { %v1580_v49 = vpop.permute.xlu1 %1579 }
  0xf6   :  { %v3820_v61 = vpop.permute.xlu0 %1574  ;;  %v1613_v22 = vadd.f32 %v1580_v49, %v3824_v7 }
  0xf7   :  { %v1612_v15 = vadd.f32 %v3820_v61, %v3828_v27 }
  0xf8   :  { %2837 = vrcp.f32 %v1613_v22  ;;  %v2834_v14 = vpop.eup %2833 }
  0xf9   :  { %2839 = vrcp.f32 %v1612_v15  ;;  %v2836_v39 = vpop.eup %2835  ;;  %v3866_v33 = vmul.f32 %v2834_v14, %v1570_v21 }
  0xfa   :  { %v3830_v62 = vpop.permute.xlu1 %1487  ;;  %v3870_v30 = vmul.f32 %v2836_v39, %v1565_v19 }
  0xfb   :  { %v3833_v28 = vpop.permute.xlu0 %1482  ;;  %v3843_v38 = vmul.f32 %v3763_v35, %v3830_v62  ;;  %v1675_v19 = vmul.f32 %v3866_v33, %v1515_v4 }
  0xfc   :  { %v3858_v3 = vmul.f32 %v3763_v35, %v3833_v28  ;;  %v1674_v43 = vmul.f32 %v3870_v30, %v1514_v44 }
  0xfd   :  { %v1691_v4 = vadd.f32 %v1675_v19, %v3796_v53 }
  0xfe   :  { %v3845_v0 = vpop.permute.xlu1 %1589  ;;  %v1690_v26 = vadd.f32 %v1674_v43, %v3798_v52 }
  0xff   :  { %v3852_v6 = vpop.permute.xlu0 %1584  ;;  %v1615_v20 = vadd.f32 %v3845_v0, %v3843_v38 }
 0x100   :  { %v1614_v13 = vadd.f32 %v3852_v6, %v3858_v3 }
 0x101   :  { %2841 = vrcp.f32 %v1615_v20 }
 0x102   :  { %v3872_v45 = vpop.permute.xlu1 %1497  ;;  %v2838_v16 = vpop.eup %2837  ;;  %2843 = vrcp.f32 %v3598_v23  ;;  %v1688_v23 = vadd.f32 %v1672_v59, %v3794_v51 }
 0x103   :  { %v3879_v21 = vpop.permute.xlu0 %1492  ;;  %2845 = vrcp.f32 %v1685_v54  ;;  %v3889_v32 = vmul.f32 %v3763_v35, %v3872_v45  ;;  %v2840_v2 = vpop.eup %2839  ;;  %v3892_v24 = vmul.f32 %v2838_v16, %v1580_v49 }
 0x104   :  { %2847 = vrcp.f32 %v1614_v13  ;;  %v3897_v36 = vmul.f32 %v3763_v35, %v3879_v21  ;;  %v3901_v22 = vmul.f32 %v2840_v2, %v3820_v61 }
 0x105   :  { %2849 = vrcp.f32 %v1684_v5  ;;  %v1677_v49 = vmul.f32 %v3892_v24, %v3824_v7 }
 0x106   :  { %v1600_v34 = vpop.permute.xlu1 %1599  ;;  %2851 = vrcp.f32 %v1687_v17  ;;  %v1676_v52 = vmul.f32 %v3901_v22, %v3828_v27 }
 0x107   :  { %2853 = vrcp.f32 %v1686_v63  ;;  %v1595_v44 = vpop.permute.xlu0 %1594  ;;  %v1617_v51 = vadd.f32 %v1600_v34, %v3889_v32  ;;  %v1693_v61 = vadd.f32 %v1677_v49, %v3810_v60 }
 0x108   :  { %2855 = vrcp.f32 %v1689_v10  ;;  %v1616_v53 = vadd.f32 %v1595_v44, %v3897_v36  ;;  %v1692_v27 = vadd.f32 %v1676_v52, %v3816_v46 }
 0x109   :  { %2857 = vrcp.f32 %v1688_v23 }
 0x10a   :  { %2859 = vrcp.f32 %v1691_v4 }
 0x10b   :  { %v2842_v8 = vpop.eup %2841  ;;  %2861 = vrcp.f32 %v1690_v26 }
 0x10c   :  { %v3907_v35 = vpop.eup %2843  ;;  %2863 = vrcp.f32 %v1617_v51  ;;  %v3916_v7 = vmul.f32 %v2842_v8, %v3845_v0 }
 0x10d   :  { %v3911_v50 = vpop.eup %2845  ;;  %2865 = vlog2.f32 %v3775_v56 }
 0x10e   :  { %v2848_v15 = vpop.eup %2847  ;;  %4291 = vst [vmem:[#allocation10_spill] sm:$0xff] %v3916_v7  ;;  %2867 = vrcp.f32 %v1616_v53  ;;  %v1679_v0 = vmul.f32 %v3916_v7, %v3843_v38 }
 0x10f   :  { %v3918_v37 = vpop.eup %2849  ;;  %2869 = vlog2.f32 %v3778_v41  ;;  %v3928_v60 = vmul.f32 %v2848_v15, %v3852_v6 }
 0x110   :  { %v3921_v31 = vpop.eup %2851  ;;  %2871 = vlog2.f32 %v3911_v50  ;;  %v1695_v20 = vadd.f32 %v1679_v0, %v3830_v62  ;;  %v3954_v13 = vmul.f32 -0.5, %v3918_v37  ;;  %v3957_v62 = vmul.f32 -0.5, %v3911_v50 }
 0x111   :  { %v3925_v47 = vpop.eup %2853  ;;  %2873 = vrcp.f32 %v1693_v61  ;;  %4292 = vst [vmem:[#allocation18_spill] sm:$0xff] %v3928_v60  ;;  %v1678_v6 = vmul.f32 %v3928_v60, %v3858_v3 }
 0x112   :  { %v3930_v14 = vpop.eup %2855  ;;  %2875 = vlog2.f32 %v3918_v37  ;;  %v3964_v17 = vmul.f32 -0.5, %v3925_v47 }
 0x113   :  { %v3935_v29 = vpop.eup %2857  ;;  %2877 = vlog2.f32 %v3921_v31  ;;  %v1694_v25 = vadd.f32 %v1678_v6, %v3833_v28  ;;  %v3967_v28 = vmul.f32 -0.5, %v3921_v31 }
 0x114   :  { %v3938_v46 = vpop.eup %2859  ;;  %2879 = vrcp.f32 %v1692_v27  ;;  %v3986_v51 = vmul.f32 -0.5, %v3935_v29 }
 0x115   :  { %v3940_v39 = vpop.eup %2861  ;;  %2881 = vlog2.f32 %v3925_v47  ;;  %v3992_v53 = vmul.f32 -0.5, %v3938_v46 }
 0x116   :  { %v2864_v1 = vpop.eup %2863  ;;  %2883 = vlog2.f32 %v3930_v14  ;;  %v3989_v49 = vmul.f32 -0.5, %v3940_v39 }
 0x117   :  { %v2866_v38 = vpop.eup %2865  ;;  %2885 = vlog2.f32 %v3935_v29  ;;  %v3950_v58 = vmul.f32 %v2864_v1, %v1600_v34  ;;  %v3981_v34 = vmul.f32 -0.5, %v3930_v14 }
 0x118   :  { %v2868_v42 = vpop.eup %2867  ;;  %2887 = vlog2.f32 %v3938_v46  ;;  %v3971_v43 = vmul.f32 0.6931472, %v2866_v38 }
 0x119   :  { %v2870_v54 = vpop.eup %2869  ;;  %4293 = vst [vmem:[#allocation26_spill] sm:$0xff] %v3950_v58  ;;  %2889 = vlog2.f32 %v3940_v39  ;;  %v3961_v59 = vmul.f32 %v2868_v42, %v1595_v44  ;;  %v1681_v63 = vmul.f32 %v3950_v58, %v3889_v32 }
 0x11a   :  { %v2872_v3 = vpop.eup %2871  ;;  %2891 = vrcp.f32 %v1695_v20  ;;  %v3975_v2 = vmul.f32 0.6931472, %v2870_v54 }
 0x11b   :  { %v3959_v5 = vpop.eup %2873  ;;  %4294 = vst [vmem:[#allocation20_spill] sm:$0xff] %v3961_v59  ;;  %2893 = vrcp.f32 %v1694_v25  ;;  %v1680_v26 = vmul.f32 %v3961_v59, %v3897_v36  ;;  %v3994_v27 = vmul.f32 0.6931472, %v2872_v3  ;;  %v1697_v1 = vadd.f32 %v1681_v63, %v3872_v45 }
 0x11c   :  { %v2876_v16 = vpop.eup %2875  ;;  %2895 = vlog2.f32 %v3959_v5  ;;  %v3999_v0 = vmul.f32 -0.5, %v3959_v5 }
 0x11d   :  { %v2878_v19 = vpop.eup %2877  ;;  %v4007_v25 = vmul.f32 0.6931472, %v2876_v16  ;;  %v1696_v36 = vadd.f32 %v1680_v26, %v3879_v21 }
 0x11e   :  { %v3973_v10 = vpop.eup %2879  ;;  %v4009_v3 = vmul.f32 0.6931472, %v2878_v19 }
 0x11f   :  { %v2882_v4 = vpop.eup %2881  ;;  %2897 = vlog2.f32 %v3973_v10  ;;  %v4004_v38 = vmul.f32 -0.5, %v3973_v10 }
 0x120   :  { %v2884_v8 = vpop.eup %2883  ;;  %2899 = vrcp.f32 %v1697_v1 }
 0x121   :  { %v2886_v6 = vpop.eup %2885  ;;  %4295 = vst [vmem:[#allocation22_spill] sm:$0xff] %v4004_v38  ;;  %v4022_v58 = vmul.f32 0.6931472, %v2884_v8  ;;  %2901 = vrcp.f32 %v1696_v36 }
 0x122   :  { %v2888_v42 = vpop.eup %2887  ;;  %v4024_v21 = vmul.f32 0.6931472, %v2886_v6 }
 0x123   :  { %v4031_v7 = vmul.f32 0.6931472, %v2888_v42 }
 0x150   :  { %v2339_v44 = vpop.f32.mrb[0].mxu1 }
 0x151   :  { %v2507_v32 = vpop.f32.mrb[0].mxu0  ;;  %v657_v61 = vpop.f32.mrb[1].mxu1 }
 0x152   :  { %v2721_v52 = vadd.f32 %v2507_v32, %v2339_v44  ;;  %v1267_v15 = vpop.f32.mrb[1].mxu0  ;;  %v4011_v44 = vmul.f32 0.6931472, %v2882_v4  ;;  %v2890_v32 = vpop.eup %2889 }
 0x153   :  { %v2722_v20 = vadd.f32 %v1267_v15, %v657_v61 }
 0x154   :  { %v1369_v54 = vmul.f32 %v3907_v35, %v2721_v52  ;;  %v2342_v63 = vpop.f32.mrb[2].mxu1  ;;  %v4019_v52 = vpop.eup %2891 }
 0x155   :  { %v1368_v45 = vmul.f32 %v3907_v35, %v2722_v20  ;;  %v2510_v61 = vpop.f32.mrb[2].mxu0  ;;  %v671_v4 = vpop.f32.mrb[3].mxu1  ;;  %v4040_v1 = vmul.f32 -0.5, %v4019_v52  ;;  %2903 = vlog2.f32 %v4019_v52 }
 0x156   :  { %v1651_v16 = vmul.f32 %v3772_v48, %v1369_v54  ;;  %v2723_v19 = vadd.f32 %v2510_v61, %v2342_v63  ;;  %v1279_v59 = vpop.f32.mrb[3].mxu0  ;;  %v4033_v48 = vmul.f32 0.6931472, %v2890_v32  ;;  %v4035_v54 = vpop.eup %2893 }
 0x157   :  { %v1650_v26 = vmul.f32 %v3769_v11, %v1368_v45  ;;  %v2724_v20 = vadd.f32 %v1279_v59, %v671_v4  ;;  %v2896_v45 = vpop.eup %2895  ;;  %2905 = vlog2.f32 %v4035_v54 }
 0x158   :  { %v1731_v23 = vmul.f32 %v3778_v41, %v1651_v16  ;;  %v1371_v60 = vmul.f32 %v3907_v35, %v2723_v19  ;;  %v2345_v11 = vpop.f32.mrb[4].mxu1 }
 0x159   :  { %v1730_v8 = vmul.f32 %v3775_v56, %v1650_v26  ;;  %v1370_v6 = vmul.f32 %v3907_v35, %v2724_v20  ;;  %v2513_v59 = vpop.f32.mrb[4].mxu0  ;;  %v685_v61 = vpop.f32.mrb[5].mxu1 }
 0x15a   :  { %v1795_v41 = vmul.f32 %v1731_v23, %v1651_v16  ;;  %v1653_v63 = vmul.f32 %v3835_v57, %v1371_v60  ;;  %v2725_v42 = vadd.f32 %v2513_v59, %v2345_v11  ;;  %v1291_v32 = vpop.f32.mrb[5].mxu0  ;;  %v4049_v16 = vmul.f32 -0.5, %v4035_v54  ;;  %v2898_v57 = vpop.eup %2897 }
 0x15b   :  { %v1794_v19 = vmul.f32 %v1730_v8, %v1650_v26  ;;  %v1652_v36 = vmul.f32 %v3839_v9, %v1370_v6  ;;  %v2726_v56 = vadd.f32 %v1291_v32, %v685_v61  ;;  %v1746_v4 = vpack.c.bf16 %v1731_v23, %v1730_v8 }
 0x15c   :  { %v1843_v20 = vsub.f32 %v1795_v41, %v3975_v2  ;;  %v1733_v15 = vmul.f32 %v3911_v50, %v1653_v63  ;;  %v1373_v38 = vmul.f32 %v3907_v35, %v2725_v42  ;;  %v2348_v59 = vpop.f32.mrb[6].mxu1  ;;  %v4054_v23 = vmul.f32 0.6931472, %v2896_v45 }
 0x15d   :  { %v1842_v60 = vsub.f32 %v1794_v19, %v3971_v43  ;;  %v1732_v11 = vmul.f32 %v3918_v37, %v1652_v36  ;;  %v1372_v26 = vmul.f32 %v3907_v35, %v2726_v56  ;;  %v2516_v9 = vpop.f32.mrb[6].mxu0  ;;  %2172 = vmatpush3.bf16.msra.mxu1 %v1746_v4  ;;  %v699_v6 = vpop.f32.mrb[7].mxu1  ;;  %v4296_v42 = vpack.c.bf16 %v3957_v62, %v3954_v13 }
 0x15e   :  { %v1797_v2 = vmul.f32 %v1733_v15, %v1653_v63  ;;  %v1655_v50 = vmul.f32 %v3847_v55, %v1373_v38  ;;  %v2727_v8 = vadd.f32 %v2516_v9, %v2348_v59  ;;  %v1303_v41 = vpop.f32.mrb[7].mxu0  ;;  %v4064_v55 = vmul.f32 0.6931472, %v2898_v57  ;;  %v4066_v38 = vpop.eup %2899 }
 0x15f   :  { %2173 = vmatprep.subr.bf16.mxu1 %v4296_v42  ;;  %v1858_v37 = vadd.f32 %v1843_v20, %v1842_v60  ;;  %v1796_v43 = vmul.f32 %v1732_v11, %v1652_v36  ;;  %v1654_v61 = vmul.f32 %v3850_v40, %v1372_v26  ;;  %v2728_v32 = vadd.f32 %v1303_v41, %v699_v6  ;;  %v4075_v26 = vpop.eup %2901 }
 0x160   :  { %v1735_v45 = vmul.f32 %v3921_v31, %v1655_v50  ;;  %v1375_v63 = vmul.f32 %v3907_v35, %v2727_v8  ;;  %v1747_v19 = vpack.c.bf16 %v1733_v15, %v1732_v11  ;;  %v2351_v4 = vpop.f32.mrb[8].mxu1  ;;  %v1784_v40 = vpack.c.bf16 %v4040_v1, %v4049_v16  ;;  %v4081_v6 = vpop.eup %2903 }
 0x161   :  { %v1844_v56 = vsub.f32 %v1796_v43, %v4007_v25  ;;  %v1734_v13 = vmul.f32 %v3925_v47, %v1654_v61  ;;  %v1374_v62 = vmul.f32 %v3907_v35, %v2728_v32  ;;  %v2519_v36 = vpop.f32.mrb[8].mxu0  ;;  %v1845_v31 = vsub.f32 %v1797_v2, %v3994_v27  ;;  %v713_v60 = vpop.f32.mrb[9].mxu1 }
 0x162   :  { %v1799_v20 = vmul.f32 %v1735_v45, %v1655_v50  ;;  %v1657_v15 = vmul.f32 %v3854_v12, %v1375_v63  ;;  %v2729_v57 = vadd.f32 %v2519_v36, %v2351_v4  ;;  %2174 = vmatpush3.bf16.msra.mxu1 %v1747_v19  ;;  %v1315_v11 = vpop.f32.mrb[9].mxu0  ;;  %v4297_v8 = vpack.c.bf16 %v3967_v28, %v3964_v17 }
 0x163   :  { %v1859_v25 = vadd.f32 %v1858_v37, %v1844_v56  ;;  %v1798_v47 = vmul.f32 %v1734_v13, %v1654_v61  ;;  %v1656_v59 = vmul.f32 %v3861_v18, %v1374_v62  ;;  %v2730_v9 = vadd.f32 %v1315_v11, %v713_v60 }
 0x164   :  { %2175 = vmatprep.subr.bf16.mxu1 %v4297_v8  ;;  %v1737_v27 = vmul.f32 %v3930_v14, %v1657_v15  ;;  %v1377_v12 = vmul.f32 %v3907_v35, %v2729_v57  ;;  %v1748_v2 = vpack.c.bf16 %v1735_v45, %v1734_v13  ;;  %2907 = vlog2.f32 %v4066_v38  ;;  %v2354_v37 = vpop.f32.mrb[10].mxu1  ;;  %v2906_v13 = vpop.eup %2905 }
 0x165   :  { %v1846_v50 = vsub.f32 %v1798_v47, %v4011_v44  ;;  %v1860_v41 = vadd.f32 %v1859_v25, %v1845_v31  ;;  %v1736_v42 = vmul.f32 %v3935_v29, %v1656_v59  ;;  %v1376_v18 = vmul.f32 %v3907_v35, %v2730_v9  ;;  %v2522_v43 = vpop.f32.mrb[10].mxu0  ;;  %v727_v32 = vpop.f32.mrb[11].mxu1 }
 0x166   :  { %v1847_v17 = vsub.f32 %v1799_v20, %v4009_v3  ;;  %v1801_v28 = vmul.f32 %v1737_v27, %v1657_v15  ;;  %v1659_v61 = vmul.f32 %v3866_v33, %v1377_v12  ;;  %v2731_v14 = vadd.f32 %v2522_v43, %v2354_v37  ;;  %2176 = vmatpush3.bf16.msra.mxu1 %v1748_v2  ;;  %v1327_v45 = vpop.f32.mrb[11].mxu0 }
 0x167   :  { %v1861_v63 = vadd.f32 %v1860_v41, %v1846_v50  ;;  %v1800_v19 = vmul.f32 %v1736_v42, %v1656_v59  ;;  %v1658_v44 = vmul.f32 %v3870_v30, %v1376_v18  ;;  %v2732_v56 = vadd.f32 %v1327_v45, %v727_v32  ;;  %v4300_v18 = vld [vmem:[#allocation10_spill] sm:$0xff] }
 0x168   :  { %v4298_v29 = vpack.c.bf16 %v3981_v34, %v3986_v51  ;;  %v1739_v62 = vmul.f32 %v3938_v46, %v1659_v61  ;;  %v1379_v3 = vmul.f32 %v3907_v35, %v2731_v14  ;;  %v1749_v4 = vpack.c.bf16 %v1737_v27, %v1736_v42  ;;  %v2357_v20 = vpop.f32.mrb[12].mxu1 }
 0x169   :  { %2909 = vlog2.f32 %v4075_v26  ;;  %v1848_v33 = vsub.f32 %v1800_v19, %v4024_v21  ;;  %v1862_v36 = vadd.f32 %v1861_v63, %v1847_v17  ;;  %v1738_v31 = vmul.f32 %v3940_v39, %v1658_v44  ;;  %v2525_v15 = vpop.f32.mrb[12].mxu0  ;;  %v741_v60 = vpop.f32.mrb[13].mxu1 }
 0x16a   :  { %2177 = vmatprep.subr.bf16.mxu1 %v4298_v29  ;;  %v1378_v30 = vmul.f32 %v3907_v35, %v2732_v56  ;;  %v1849_v34 = vsub.f32 %v1801_v28, %v4022_v58  ;;  %v1803_v51 = vmul.f32 %v1739_v62, %v1659_v61  ;;  %v1661_v57 = vmul.f32 %v3892_v24, %v1379_v3  ;;  %v1339_v11 = vpop.f32.mrb[13].mxu0 }
 0x16b   :  { %v2733_v46 = vadd.f32 %v2525_v15, %v2357_v20  ;;  %2178 = vmatpush3.bf16.msra.mxu1 %v1749_v4  ;;  %v1863_v25 = vadd.f32 %v1862_v36, %v1848_v33  ;;  %v1802_v47 = vmul.f32 %v1738_v31, %v1658_v44  ;;  %v2734_v59 = vadd.f32 %v1339_v11, %v741_v60  ;;  %v4305_v15 = vld [vmem:[#allocation20_spill] sm:$0xff] }
 0x16c   :  { %v1660_v21 = vmul.f32 %v3901_v22, %v1378_v30  ;;  %v4299_v39 = vpack.c.bf16 %v3992_v53, %v3989_v49  ;;  %v1741_v9 = vmul.f32 %v3959_v5, %v1661_v57  ;;  %v1750_v8 = vpack.c.bf16 %v1739_v62, %v1738_v31  ;;  %v2360_v22 = vpop.f32.mrb[14].mxu1  ;;  %v4304_v31 = vld [vmem:[#allocation26_spill] sm:$0xff] }
 0x16d   :  { %v1381_v58 = vmul.f32 %v3907_v35, %v2733_v46  ;;  %v1777_v24 = vmul.f32 -0.5, %v4066_v38  ;;  %v1850_v27 = vsub.f32 %v1802_v47, %v4033_v48  ;;  %v1864_v12 = vadd.f32 %v1863_v25, %v1849_v34  ;;  %v2528_v41 = vpop.f32.mrb[14].mxu0  ;;  %v755_v43 = vpop.f32.mrb[15].mxu1  ;;  %v4301_v48 = vld [vmem:[#allocation18_spill] sm:$0xff] }
 0x16e   :  { %2179 = vmatprep.subr.bf16.mxu1 %v4299_v39  ;;  %v1740_v2 = vmul.f32 %v3973_v10, %v1660_v21  ;;  %v1380_v50 = vmul.f32 %v3907_v35, %v2734_v59  ;;  %v2908_v42 = vpop.eup %2907  ;;  %v1851_v49 = vsub.f32 %v1803_v51, %v4031_v7  ;;  %v1805_v53 = vmul.f32 %v1741_v9, %v1661_v57  ;;  %v1351_v17 = vpop.f32.mrb[15].mxu0  ;;  %v4302_v10 = vld [vmem:[#allocation22_spill] sm:$0xff] }
 0x16f   :  { %v1663_v5 = vmul.f32 %v4300_v18, %v1381_v58  ;;  %v2735_v37 = vadd.f32 %v2528_v41, %v2360_v22  ;;  %2180 = vmatpush3.bf16.msra.mxu1 %v1750_v8  ;;  %v1865_v28 = vadd.f32 %v1864_v12, %v1850_v27  ;;  %v2736_v32 = vadd.f32 %v1351_v17, %v755_v43 }
 0x170   :  { %v1804_v61 = vmul.f32 %v1740_v2, %v1660_v21  ;;  %v1662_v14 = vmul.f32 %v4301_v48, %v1380_v50  ;;  %v4303_v45 = vpack.c.bf16 %v3999_v0, %v4302_v10  ;;  %v1751_v19 = vpack.c.bf16 %v1741_v9, %v1740_v2 }
 0x171   :  { %v1743_v63 = vmul.f32 %v4019_v52, %v1663_v5  ;;  %v1383_v7 = vmul.f32 %v3907_v35, %v2735_v37  ;;  %v1776_v44 = vmul.f32 -0.5, %v4075_v26  ;;  %v1866_v29 = vadd.f32 %v1865_v28, %v1851_v49 }
 0x172   :  { %2181 = vmatprep.subr.bf16.mxu1 %v4303_v45  ;;  %v1852_v56 = vsub.f32 %v1804_v61, %v4064_v55  ;;  %v1742_v62 = vmul.f32 %v4035_v54, %v1662_v14  ;;  %v1382_v3 = vmul.f32 %v3907_v35, %v2736_v32  ;;  %v1853_v33 = vsub.f32 %v1805_v53, %v4054_v23 }
 0x173   :  { %v2910_v4 = vpop.eup %2909  ;;  %v1807_v36 = vmul.f32 %v1743_v63, %v1663_v5  ;;  %v1835_v0 = vmul.f32 0.6931472, %v2906_v13  ;;  %v1665_v30 = vmul.f32 %v4304_v31, %v1383_v7  ;;  %2182 = vmatpush3.bf16.msra.mxu1 %v1751_v19  ;;  %v1837_v54 = vmul.f32 0.6931472, %v4081_v6 }
 0x174   :  { %v1867_v52 = vadd.f32 %v1866_v29, %v1852_v56  ;;  %v1806_v20 = vmul.f32 %v1742_v62, %v1662_v14  ;;  %v1664_v34 = vmul.f32 %v4305_v15, %v1382_v3  ;;  %2183 = vmatprep.subr.bf16.mxu1 %v1784_v40  ;;  %v1752_v55 = vpack.c.bf16 %v1743_v63, %v1742_v62 }
 0x175   :  { %v1745_v35 = vmul.f32 %v4066_v38, %v1665_v30  ;;  %v1785_v57 = vpack.c.bf16 %v1777_v24, %v1776_v44  ;;  %v1855_v46 = vsub.f32 %v1807_v36, %v1837_v54  ;;  %v1839_v60 = vmul.f32 0.6931472, %v2910_v4  ;;  %v2808_v38 = vld [vmem:[%s4154_s5] ss:$8 sps:$4 sm:$0xff]   ;;  %s2961_s5 = smov [#allocation7]  }
 0x176   :  { %v1854_v51 = vsub.f32 %v1806_v20, %v1835_v0  ;;  %v1868_v23 = vadd.f32 %v1867_v52, %v1853_v33  ;;  %v1744_v13 = vmul.f32 %v4075_v26, %v1664_v34  ;;  %v1841_v1 = vmul.f32 0.6931472, %v2908_v42  ;;  %s1964_s10 = sshll.u32 %s2961_s5, 4  ;;  %s1965_s10 = int_to_ptr.vmem [resolvable:$true] %s1964_s10 }
 0x177   :  { %2184 = vmatpush3.bf16.msra.mxu1 %v1752_v55  ;;  %v1809_v25 = vmul.f32 %v1745_v35, %v1665_v30  ;;  %s2933_s11 = scalar_lea.vmem %s1965_s10, 256  ;;  %p2938_p9 = scmp.lt.s32.totalorder %s1965_s10, %s1965_s10 }
 0x178   :  { %v1869_v11 = vadd.f32 %v1868_v23, %v1854_v51  ;;  %v1808_v47 = vmul.f32 %v1744_v13, %v1664_v34  ;;  %2185 = vmatprep.subr.bf16.mxu1 %v1785_v57  ;;  %v1753_v21 = vpack.c.bf16 %v1745_v35, %v1744_v13  ;;  %p2934_p8 = scmp.ne.s32.totalorder %s1965_s10, %s2933_s11  ;;  %p2939_p10 = scmp.lt.s32.totalorder %s2933_s11, %s2933_s11 }
 0x179   :  { %v1857_v6 = vsub.f32 %v1809_v25, %v1841_v1 }
 0x17a   :  { %v1856_v16 = vsub.f32 %v1808_v47, %v1839_v60  ;;  %v1870_v40 = vadd.f32 %v1869_v11, %v1855_v46  ;;  %p2940_p11 = por %p2939_p10, %p2938_p9 }
 0x17b   :  { %2186 = vmatpush3.bf16.msra.mxu1 %v1753_v21 }
 0x17c   :  { %v1871_v59 = vadd.f32 %v1870_v40, %v1856_v16  ;;  %p2941_p12 = pnand %p2940_p11, %p2934_p8 }
 0x17e   :  { %v1872_v26 = vadd.f32 %v1871_v59, %v1857_v6  ;;  %1949 = vmatmul.mubr.bf16.vlgmr.msra.gmra.mrb[16].mxu1 %v2808_v38 }
 0x180   :  { %v1873_v39 = vrot.slane %v1872_v26, 4 }
 0x182   :  { %v1874_v9 = vadd.f32 %v1873_v39, %v1872_v26 }
 0x184   :  { %v1875_v58 = vrot.slane %v1874_v9, 2 }
 0x186   :  { %v1876_v8 = vadd.f32 %v1875_v58, %v1874_v9 }
 0x188   :  { %v1877_v24 = vrot.slane %v1876_v8, 1 }
 0x18a   :  { %v1878_v27 = vadd.f32 %v1877_v24, %v1876_v8 }
 0x18c   :  { %v1879_v12 = vmul.f32 -0.5, %v1878_v27 }
 0x18e   :  { %1880 = vst [vmem:[#allocation3] sm:$0x1] %v1879_v12 }
 0x195   :  { %v1976_v42 = vld [vmem:[#allocation3] ss:$0 sm:$0xff] }
 0x251   :  { %v2187_v2 = vpop.f32.mrb[16].mxu1 }
 0x252   :  { %v2188_v50 = vpop.f32.mrb[17].mxu1 }
 0x253   :  { %v2189_v22 = vadd.f32 %v2188_v50, %v2187_v2  ;;  %v2190_v41 = vpop.f32.mrb[18].mxu1 }
 0x254   :  { %v2191_v49 = vpop.f32.mrb[19].mxu1 }
 0x255   :  { %v1951_v53 = vadd.f32 %v2189_v22, %v1976_v42  ;;  %v2192_v18 = vadd.f32 %v2191_v49, %v2190_v41 }
 0x257   :  { %1957 = vst [vmem:[#allocation7] sm:$0xff] %v1951_v53  ;;  %v1954_v5 = vadd.f32 %v2192_v18, %v1976_v42 }
 0x259   :  { %1958 = vst [vmem:[#allocation7 + $0x8] sm:$0xff] %v1954_v5 }
 0x25a   :  { %2944 = shalt.err (!%p2941_p12)
}
 0x25b   :  { %s2945_s14 = scalar_lea.hbm %s4155_s6, 256 }
 0x25c   :  { %p2946_p13 = scmp.ne.s32.totalorder %s4155_s6, %s2945_s14  ;;  %p2949_p0 = scmp.lt.u32.totalorder %s2945_s14, %s4155_s6 }
 0x25e   :  { %p2951_p1 = pnand %p2949_p0, %p2946_p13 }
 0x260   :  { %2954 = shalt.err (!%p2951_p1)
}
 0x261   :  { %s2962_s18 = smov 128   ;;  %s2963_s1 = smov 8  }
 0x262   :  { %1970 = dma.vmem_to_hbm [thread:$0]  %s1965_s10, 256, %s4155_s6, [#allocation6], %s2962_s18, %s2962_s18, %s2963_s1  }
 0x263   :  { %2957 = dma.done.wait [#allocation6], 256  }
 0x264   :  { %2958 = vsyncadd [#allocation6], 4294967040 }
 0x265   :  { %1974 = vsyncpa [#allocation5], 1 }
 0x266   :  { %1975 = vsyncpa [#allocation6], 1 }

</bundles_post_ra>
